<compile_context>
chip_gen: v6e
topology: v6e:2x2x1
jax: 0.10.0
libtpu: 0.0.40
codegen_flags: <defaults>
</compile_context>

<pallas_src>
import functools

import numpy as np
import jax
import jax.numpy as jnp
from jax.experimental import pallas as pl
from jax.experimental.pallas import tpu as pltpu


# ---------------------------------------------------------------------------
# Model hyper-parameters (identical to CurvatureModel.__init__ defaults)
# ---------------------------------------------------------------------------
N_ORIES = 16
IN_CHANNELS = 1
CURVES = np.logspace(-2, -0.1, 5)
GAU_SIZES = (5,)
FILT_SIZE = 9
FRE = [1.2]
GAMMA = 1.0
SIGX = 1.0
SIGY = 1.0

HALF = int(np.fix(FILT_SIZE / 2))              # 4
R = FILT_SIZE * FILT_SIZE                      # 81 spatial positions
R_PAD = ((R + 7) // 8) * 8                     # 88: sublane axis padded to 8-multiple
N_FILT = N_ORIES * len(CURVES) * len(GAU_SIZES) * len(FRE)   # 80 filters
N_PAD = 128                                    # lane axis padded to full width

_BIAS = float(np.exp(-SIGX / 2.0))
_INV_SIGX = float(1.0 / SIGX)


# ---------------------------------------------------------------------------
# Pallas kernel: lane-dense banana-filter evaluation + per-filter mean removal
# ---------------------------------------------------------------------------
def _banana_bank_kernel(p_ref, out_ref):
    # p_ref   : (8, N_PAD)      per-filter precomputed params, one row per quantity
    # out_ref : (R_PAD, N_PAD)  out[r, n] = filter n at flattened spatial index r
    shape = (R_PAD, N_PAD)

    # Flattened spatial index r = row*9 + col; xv = row - 4, yv = 4 - col.
    # Float decomposition (floor((r+0.5)/9)) avoids any integer-div lowering
    # concerns and is exact for r in [0, 87].
    ridx = jax.lax.broadcasted_iota(jnp.int32, shape, 0)
    rf = ridx.astype(jnp.float32)
    row_f = jnp.floor((rf + 0.5) * (1.0 / FILT_SIZE))
    col_f = rf - FILT_SIZE * row_f
    xv = row_f - float(HALF)
    yv = float(HALF) - col_f

    # Materialize each (1, N_PAD) -> (R_PAD, N_PAD) broadcast exactly once.
    ct        = jnp.broadcast_to(p_ref[0:1, :], shape)   # cos(theta)
    st        = jnp.broadcast_to(p_ref[1:2, :], shape)   # sin(theta)
    cur       = jnp.broadcast_to(p_ref[2:3, :], shape)   # curvature
    inv_sigys = jnp.broadcast_to(p_ref[3:4, :], shape)   # 1 / (sigy * gau_size)
    f         = jnp.broadcast_to(p_ref[4:5, :], shape)   # frequency
    half_f2   = jnp.broadcast_to(p_ref[5:6, :], shape)   # 0.5 * f^2

    # Rotation (kept on the VPU; K=2 would starve the MXU).
    xc = xv * ct + yv * st
    xs = yv * ct - xv * st

    k = xc + cur * xs * xs
    ks = k * _INV_SIGX
    t = xs * inv_sigys
    k2 = ks * ks + t * t
    G = jnp.exp(-k2 * half_f2)
    # real part of exp(i * f * k) is cos(f * k)
    filt = GAMMA * G * (jnp.cos(f * k) - _BIAS)

    # Per-filter mean over exactly the 81 real rows (padded rows masked out),
    # one sublane reduction for all filters at once.
    row_mask = ridx < R
    m = jnp.sum(jnp.where(row_mask, filt, 0.0), axis=0, keepdims=True) * (1.0 / R)

    # Full unmasked store; padded rows/lanes hold finite junk, sliced off later.
    out_ref[...] = filt - m


# ---------------------------------------------------------------------------
# Host-side per-filter parameter table (same nested loop order as forward())
# ---------------------------------------------------------------------------
def _host_params():
    ories = np.arange(0, 2 * np.pi, 2 * np.pi / N_ORIES)
    thetas, curs, ss, fs = [], [], [], []
    for curve in CURVES:
        for gau_size in GAU_SIZES:
            for orie in ories:
                for f in FRE:
                    curs.append(curve)
                    ss.append(gau_size)
                    thetas.append(orie)
                    fs.append(f)
    thetas = np.asarray(thetas, np.float64)
    curs = np.asarray(curs, np.float64)
    ss = np.asarray(ss, np.float64)
    fs = np.asarray(fs, np.float64)

    p = np.zeros((8, N_PAD), np.float32)
    p[0, :N_FILT] = np.cos(thetas)
    p[1, :N_FILT] = np.sin(thetas)
    p[2, :N_FILT] = curs
    p[3, :N_FILT] = 1.0 / (SIGY * ss)
    p[4, :N_FILT] = fs
    p[5, :N_FILT] = 0.5 * fs * fs
    return p


# ---------------------------------------------------------------------------
# Jitted forward: pallas_call + epilogue fused into one dispatch
# ---------------------------------------------------------------------------
@jax.jit
def _forward_jit(params):
    slab = pl.pallas_call(
        _banana_bank_kernel,
        out_shape=jax.ShapeDtypeStruct((R_PAD, N_PAD), jnp.float32),
        in_specs=[pl.BlockSpec(memory_space=pltpu.MemorySpace.VMEM)],
        out_specs=pl.BlockSpec(memory_space=pltpu.MemorySpace.VMEM),
    )(params)

    # (88,128) -> (81,80) -> (80,81) -> (80,9,9): fused epilogue inside the jit.
    bank = slab[:R, :N_FILT].T.reshape(N_FILT, FILT_SIZE, FILT_SIZE)
    w = bank[:, None, :, :]
    if IN_CHANNELS > 1:
        # reference writes only input-channel 0; remaining channels stay zero
        w = jnp.pad(w, ((0, 0), (0, IN_CHANNELS - 1), (0, 0), (0, 0)))
    return w


@functools.lru_cache(maxsize=1)
def curvature_model_forward():
    """Returns w: (N_FILT, IN_CHANNELS, FILT_SIZE, FILT_SIZE) float32 (OIHW).

    Input-free constant generator: computed once and cached as a device array.
    """
    params = jnp.asarray(_host_params())
    return _forward_jit(params)


# ---------------------------------------------------------------------------
# Pure numpy reference (identical math to the PyTorch module) for verification
# ---------------------------------------------------------------------------
def _banana_filter_ref(s, fre, theta, cur, gamma, sigx, sigy, sz):
    xv, yv = np.meshgrid(
        np.arange(np.fix(-sz / 2).item(), np.fix(sz / 2).item() + sz % 2),
        np.arange(np.fix(sz / 2).item(), np.fix(-sz / 2).item() - sz % 2, -1),
    )
    xv = xv.T
    yv = yv.T
    xc = xv * np.cos(theta) + yv * np.sin(theta)
    xs = -xv * np.sin(theta) + yv * np.cos(theta)
    bias = np.exp(-sigx / 2)
    k = xc + cur * xs ** 2
    k2 = (k / sigx) ** 2 + (xs / (sigy * s)) ** 2
    G = np.exp(-k2 * fre ** 2 / 2)
    Fc = np.exp(fre * k * 1j)
    filt = gamma * G * (Fc - bias)
    filt = np.real(filt)
    filt -= filt.mean()
    return filt.astype(np.float32)


def _reference_forward():
    ories = np.arange(0, 2 * np.pi, 2 * np.pi / N_ORIES)
    w = np.zeros((N_FILT, IN_CHANNELS, FILT_SIZE, FILT_SIZE), np.float32)
    i = 0
    for curve in CURVES:
        for gau_size in GAU_SIZES:
            for orie in ories:
                for f in FRE:
                    w[i, 0, :, :] = _banana_filter_ref(
                        gau_size, f, orie, curve, GAMMA, SIGX, SIGY, FILT_SIZE
                    )
                    i += 1
    return w


if __name__ == "__main__":
    # forward() takes no tensor input; key kept only for interface consistency.
    _ = jax.random.PRNGKey(0)

    w = curvature_model_forward()
    w = jax.block_until_ready(w)

    # Second call hits the cache (no re-dispatch of the constant generator).
    w_again = curvature_model_forward()
    assert w_again is w

    w_ref = _reference_forward()
    assert w.shape == w_ref.shape, (w.shape, w_ref.shape)
    assert w.dtype == jnp.float32
    np.testing.assert_allclose(np.asarray(w), w_ref, rtol=1e-4, atol=1e-5)

    print("KERNEL_OK")
</pallas_src>

<mosaic_0001>
module attributes {stable_mosaic.version = 11 : i64} {
  func.func @_banana_bank_kernel(%arg0: memref<8x128xf32, #tpu.memory_space<vmem>>, %arg1: memref<88x128xf32, #tpu.memory_space<vmem>>) attributes {dimension_semantics = [], scalar_prefetch = 0 : i64, scratch_operands = 0 : i64, tpu.core_type = #tpu.core_type<tc>} {
    %0 = tpu.iota {dimensions = array<i32: 0>} : vector<88x128xi32>
    %1 = arith.sitofp %0 : vector<88x128xi32> to vector<88x128xf32>
    %cst = arith.constant 5.000000e-01 : f32
    %2 = vector.broadcast %cst : f32 to vector<88x128xf32>
    %3 = arith.addf %1, %2 : vector<88x128xf32>
    %cst_0 = arith.constant 0.111111112 : f32
    %4 = vector.broadcast %cst_0 : f32 to vector<88x128xf32>
    %5 = arith.mulf %3, %4 : vector<88x128xf32>
    %6 = math.floor %5 : vector<88x128xf32>
    %cst_1 = arith.constant 9.000000e+00 : f32
    %7 = vector.broadcast %cst_1 : f32 to vector<88x128xf32>
    %8 = arith.mulf %7, %6 : vector<88x128xf32>
    %9 = arith.subf %1, %8 : vector<88x128xf32>
    %cst_2 = arith.constant 4.000000e+00 : f32
    %10 = vector.broadcast %cst_2 : f32 to vector<88x128xf32>
    %11 = arith.subf %6, %10 : vector<88x128xf32>
    %cst_3 = arith.constant 4.000000e+00 : f32
    %12 = vector.broadcast %cst_3 : f32 to vector<88x128xf32>
    %13 = arith.subf %12, %9 : vector<88x128xf32>
    %c0 = arith.constant 0 : index
    %c0_4 = arith.constant 0 : index
    %14 = vector.load %arg0[%c0, %c0_4] : memref<8x128xf32, #tpu.memory_space<vmem>>, vector<1x128xf32>
    %15 = vector.shape_cast %14 : vector<1x128xf32> to vector<1x128xf32>
    %16 = vector.broadcast %15 : vector<1x128xf32> to vector<88x128xf32>
    %c1 = arith.constant 1 : index
    %c0_5 = arith.constant 0 : index
    %17 = vector.load %arg0[%c1, %c0_5] : memref<8x128xf32, #tpu.memory_space<vmem>>, vector<1x128xf32>
    %18 = vector.shape_cast %17 : vector<1x128xf32> to vector<1x128xf32>
    %19 = vector.broadcast %18 : vector<1x128xf32> to vector<88x128xf32>
    %c2 = arith.constant 2 : index
    %c0_6 = arith.constant 0 : index
    %20 = vector.load %arg0[%c2, %c0_6] : memref<8x128xf32, #tpu.memory_space<vmem>>, vector<1x128xf32>
    %21 = vector.shape_cast %20 : vector<1x128xf32> to vector<1x128xf32>
    %22 = vector.broadcast %21 : vector<1x128xf32> to vector<88x128xf32>
    %c3 = arith.constant 3 : index
    %c0_7 = arith.constant 0 : index
    %23 = vector.load %arg0[%c3, %c0_7] : memref<8x128xf32, #tpu.memory_space<vmem>>, vector<1x128xf32>
    %24 = vector.shape_cast %23 : vector<1x128xf32> to vector<1x128xf32>
    %25 = vector.broadcast %24 : vector<1x128xf32> to vector<88x128xf32>
    %c4 = arith.constant 4 : index
    %c0_8 = arith.constant 0 : index
    %26 = vector.load %arg0[%c4, %c0_8] : memref<8x128xf32, #tpu.memory_space<vmem>>, vector<1x128xf32>
    %27 = vector.shape_cast %26 : vector<1x128xf32> to vector<1x128xf32>
    %28 = vector.broadcast %27 : vector<1x128xf32> to vector<88x128xf32>
    %c5 = arith.constant 5 : index
    %c0_9 = arith.constant 0 : index
    %29 = vector.load %arg0[%c5, %c0_9] : memref<8x128xf32, #tpu.memory_space<vmem>>, vector<1x128xf32>
    %30 = vector.shape_cast %29 : vector<1x128xf32> to vector<1x128xf32>
    %31 = vector.broadcast %30 : vector<1x128xf32> to vector<88x128xf32>
    %32 = arith.mulf %11, %16 : vector<88x128xf32>
    %33 = arith.mulf %13, %19 : vector<88x128xf32>
    %34 = arith.addf %32, %33 : vector<88x128xf32>
    %35 = arith.mulf %13, %16 : vector<88x128xf32>
    %36 = arith.mulf %11, %19 : vector<88x128xf32>
    %37 = arith.subf %35, %36 : vector<88x128xf32>
    %38 = arith.mulf %22, %37 : vector<88x128xf32>
    %39 = arith.mulf %38, %37 : vector<88x128xf32>
    %40 = arith.addf %34, %39 : vector<88x128xf32>
    %cst_10 = arith.constant 1.000000e+00 : f32
    %41 = vector.broadcast %cst_10 : f32 to vector<88x128xf32>
    %42 = arith.mulf %40, %41 : vector<88x128xf32>
    %43 = arith.mulf %37, %25 : vector<88x128xf32>
    %44 = arith.mulf %42, %42 : vector<88x128xf32>
    %45 = arith.mulf %43, %43 : vector<88x128xf32>
    %46 = arith.addf %44, %45 : vector<88x128xf32>
    %cst_11 = arith.constant 0.000000e+00 : f32
    %47 = vector.broadcast %cst_11 : f32 to vector<88x128xf32>
    %48 = arith.subf %47, %46 : vector<88x128xf32>
    %49 = arith.mulf %48, %31 : vector<88x128xf32>
    %50 = math.exp %49 : vector<88x128xf32>
    %cst_12 = arith.constant 1.000000e+00 : f32
    %51 = vector.broadcast %cst_12 : f32 to vector<88x128xf32>
    %52 = arith.mulf %51, %50 : vector<88x128xf32>
    %53 = arith.mulf %28, %40 : vector<88x128xf32>
    %54 = math.cos %53 : vector<88x128xf32>
    %cst_13 = arith.constant 0.606530666 : f32
    %55 = vector.broadcast %cst_13 : f32 to vector<88x128xf32>
    %56 = arith.subf %54, %55 : vector<88x128xf32>
    %57 = arith.mulf %52, %56 : vector<88x128xf32>
    %c81_i32 = arith.constant 81 : i32
    %58 = vector.broadcast %c81_i32 : i32 to vector<88x128xi32>
    %59 = arith.cmpi slt, %0, %58 : vector<88x128xi32>
    %cst_14 = arith.constant 0.000000e+00 : f32
    %60 = vector.broadcast %cst_14 : f32 to vector<88x128xf32>
    %61 = arith.select %59, %57, %60 : vector<88x128xi1>, vector<88x128xf32>
    %cst_15 = arith.constant dense<0.000000e+00> : vector<128xf32>
    %62 = vector.multi_reduction <add>, %61, %cst_15 [0] : vector<88x128xf32> to vector<128xf32>
    %63 = vector.shape_cast %62 : vector<128xf32> to vector<1x128xf32>
    %cst_16 = arith.constant 0.0123456791 : f32
    %64 = vector.broadcast %cst_16 : f32 to vector<1x128xf32>
    %65 = arith.mulf %63, %64 : vector<1x128xf32>
    %66 = vector.broadcast %65 : vector<1x128xf32> to vector<88x128xf32>
    %67 = arith.subf %57, %66 : vector<88x128xf32>
    %c0_17 = arith.constant 0 : index
    %c0_18 = arith.constant 0 : index
    %68 = vector.load %arg1[%c0_17, %c0_18] : memref<88x128xf32, #tpu.memory_space<vmem>>, vector<88x128xf32>
    tpu.vector_store %arg1[%c0_17, %c0_18], %67 {strides = array<i32>} : memref<88x128xf32, #tpu.memory_space<vmem>>, vector<88x128xf32>,
    return
  }
}

</mosaic_0001>

<bundles_post_ra>
// kernel: _forward_jit.1
= control target key start
LH: loop header
LB: loop body
LE: loop exit
PB: predicated region body
PF: predicated region fallthrough
CT: control target
= control target key end

     0   :  { %6 = vsyncpa [#allocation3], 0  ;;  %s1781_s6 = smov [#allocation2]   ;;  %s3157_s0 = inlined_call_operand.hbm [shape: f32[8,128], index: 0, kind: input, shape index: {}]   ;;  %s3158_s1 = inlined_call_operand.vmem [shape: f32[88,128], index: 1, kind: output, shape index: {}]  }
   0x1   :  { %s13_s7 = sshll.u32 %s1781_s6, 4  ;;  %s14_s7 = int_to_ptr.vmem [resolvable:$true] %s13_s7 }
   0x2   :  { %s1767_s8 = scalar_lea.vmem %s14_s7, 128  ;;  %p1772_p1 = scmp.lt.s32.totalorder %s14_s7, %s14_s7 }
   0x3   :  { %p1768_p0 = scmp.ne.s32.totalorder %s14_s7, %s1767_s8  ;;  %p1773_p2 = scmp.lt.s32.totalorder %s1767_s8, %s1767_s8 }
   0x5   :  { %p1774_p3 = por %p1773_p2, %p1772_p1 }
   0x7   :  { %p1775_p4 = pnand %p1774_p3, %p1768_p0 }
   0x9   :  { %1778 = shalt.err (!%p1775_p4)
}
   0xa   :  { %16 = dma.hbm_to_vmem [thread:$0]  %s3157_s0, 128, %s14_s7, [#allocation3]  }
   0xb   :  { %1779 = dma.done.wait [#allocation3], 128  }
   0xc   :  { %1780 = vsyncadd [#allocation3], 4294967168  ;;  %v20_v0 = vlaneseq }
   0xe   :  { %v1801_v1 = vshrl.u32 %v20_v0, 7 }
  0x10   :  { %v1804_v2 = vadd.s32 8, %v1801_v1  ;;  %v1807_v3 = vadd.s32 16, %v1801_v1  ;;  %v1810_v4 = vadd.s32 24, %v1801_v1  ;;  %v1813_v5 = vadd.s32 32, %v1801_v1 }
  0x11   :  { %v1816_v6 = vadd.s32 40, %v1801_v1  ;;  %v1819_v7 = vadd.s32 48, %v1801_v1  ;;  %v1822_v8 = vadd.s32 56, %v1801_v1  ;;  %v1825_v9 = vadd.s32 64, %v1801_v1 }
  0x12   :  { %v1828_v10 = vadd.s32 72, %v1801_v1  ;;  %v1831_v11 = vadd.s32 80, %v1801_v1  ;;  %v32_v12 = vcvt.s32.f32 %v1801_v1  ;;  %v33_v13 = vcvt.s32.f32 %v1804_v2 }
  0x13   :  { %v34_v14 = vcvt.s32.f32 %v1807_v3  ;;  %v35_v15 = vcvt.s32.f32 %v1810_v4  ;;  %v36_v16 = vcvt.s32.f32 %v1813_v5  ;;  %v37_v17 = vcvt.s32.f32 %v1816_v6 }
  0x14   :  { %3179 = vst [vmem:[#allocation5_spill] sm:$0xff] %v1831_v11  ;;  %v38_v18 = vcvt.s32.f32 %v1819_v7  ;;  %v39_v19 = vcvt.s32.f32 %v1822_v8  ;;  %v40_v20 = vcvt.s32.f32 %v1825_v9  ;;  %v41_v21 = vcvt.s32.f32 %v1828_v10 }
  0x15   :  { %v42_v22 = vcvt.s32.f32 %v1831_v11  ;;  %v43_v23 = vadd.f32 0.5, %v32_v12  ;;  %v44_v24 = vadd.f32 0.5, %v33_v13  ;;  %v45_v25 = vadd.f32 0.5, %v34_v14 }
  0x16   :  { %v46_v26 = vadd.f32 0.5, %v35_v15  ;;  %v47_v27 = vadd.f32 0.5, %v36_v16  ;;  %v48_v28 = vadd.f32 0.5, %v37_v17  ;;  %v49_v29 = vadd.f32 0.5, %v38_v18 }
  0x17   :  { %v50_v30 = vadd.f32 0.5, %v39_v19  ;;  %v51_v31 = vadd.f32 0.5, %v40_v20  ;;  %v52_v32 = vadd.f32 0.5, %v41_v21  ;;  %v53_v33 = vadd.f32 0.5, %v42_v22 }
  0x18   :  { %v54_v34 = vmul.f32 0.11111111, %v43_v23  ;;  %v55_v35 = vmul.f32 0.11111111, %v44_v24  ;;  %v56_v36 = vmul.f32 0.11111111, %v45_v25 }
  0x19   :  { %v57_v37 = vmul.f32 0.11111111, %v46_v26  ;;  %v58_v38 = vmul.f32 0.11111111, %v47_v27  ;;  %v59_v39 = vmul.f32 0.11111111, %v48_v28 }
  0x1a   :  { %v60_v40 = vmul.f32 0.11111111, %v49_v29  ;;  %v61_v41 = vmul.f32 0.11111111, %v50_v30  ;;  %v62_v42 = vmul.f32 0.11111111, %v51_v31  ;;  %v65_v43 = vfloor.f32 %v54_v34 }
  0x1b   :  { %v63_v44 = vmul.f32 0.11111111, %v52_v32  ;;  %v64_v45 = vmul.f32 0.11111111, %v53_v33  ;;  %v66_v46 = vfloor.f32 %v55_v35  ;;  %v67_v47 = vfloor.f32 %v56_v36 }
  0x1c   :  { %v68_v48 = vfloor.f32 %v57_v37  ;;  %v69_v49 = vfloor.f32 %v58_v38  ;;  %v70_v50 = vfloor.f32 %v59_v39  ;;  %v71_v51 = vfloor.f32 %v60_v40  ;;  %v1580_v37 = vld [vmem:[#allocation2] ss:$0 sm:$0xff] }
  0x1d   :  { %v72_v52 = vfloor.f32 %v61_v41  ;;  %v73_v53 = vfloor.f32 %v62_v42  ;;  %v74_v54 = vfloor.f32 %v63_v44  ;;  %v75_v55 = vfloor.f32 %v64_v45  ;;  %v1581_v42 = vld [vmem:[#allocation2 + $0x1] ss:$0 sm:$0xff] }
  0x1e   :  { %v76_v56 = vmul.f32 9.0, %v65_v43  ;;  %v77_v57 = vmul.f32 9.0, %v66_v46  ;;  %v78_v58 = vmul.f32 9.0, %v67_v47  ;;  %v79_v59 = vmul.f32 9.0, %v68_v48 }
  0x1f   :  { %v80_v60 = vmul.f32 9.0, %v69_v49  ;;  %v81_v61 = vmul.f32 9.0, %v70_v50  ;;  %v82_v62 = vmul.f32 9.0, %v71_v51  ;;  %v83_v63 = vmul.f32 9.0, %v72_v52 }
  0x20   :  { %v84_v0 = vmul.f32 9.0, %v73_v53  ;;  %v85_v1 = vmul.f32 9.0, %v74_v54  ;;  %v86_v2 = vmul.f32 9.0, %v75_v55  ;;  %v1844_v3 = vsub.f32 %v32_v12, %v76_v56 }
  0x21   :  { %v1846_v4 = vsub.f32 %v33_v13, %v77_v57  ;;  %v1848_v5 = vsub.f32 %v34_v14, %v78_v58  ;;  %v1850_v6 = vsub.f32 %v35_v15, %v79_v59  ;;  %v1852_v7 = vsub.f32 %v36_v16, %v80_v60 }
  0x22   :  { %v1854_v8 = vsub.f32 %v37_v17, %v81_v61  ;;  %v1856_v9 = vsub.f32 %v38_v18, %v82_v62  ;;  %v1858_v10 = vsub.f32 %v39_v19, %v83_v63  ;;  %v1860_v23 = vsub.f32 %v40_v20, %v84_v0 }
  0x23   :  { %v1862_v24 = vsub.f32 %v41_v21, %v85_v1  ;;  %v1864_v12 = vsub.f32 %v42_v22, %v86_v2  ;;  %v1866_v13 = vadd.f32 -4.0, %v65_v43  ;;  %v1868_v14 = vadd.f32 -4.0, %v66_v46 }
  0x24   :  { %v1870_v15 = vadd.f32 -4.0, %v67_v47  ;;  %v1872_v16 = vadd.f32 -4.0, %v68_v48  ;;  %v1874_v17 = vadd.f32 -4.0, %v69_v49  ;;  %v1876_v18 = vadd.f32 -4.0, %v70_v50 }
  0x25   :  { %v1878_v19 = vadd.f32 -4.0, %v71_v51  ;;  %v1880_v20 = vadd.f32 -4.0, %v72_v52  ;;  %v1882_v21 = vadd.f32 -4.0, %v73_v53  ;;  %v1884_v22 = vadd.f32 -4.0, %v74_v54 }
  0x26   :  { %v1886_v25 = vadd.f32 -4.0, %v75_v55  ;;  %v109_v26 = vsub.f32 4.0, %v1844_v3  ;;  %v110_v27 = vsub.f32 4.0, %v1846_v4  ;;  %v111_v28 = vsub.f32 4.0, %v1848_v5 }
  0x27   :  { %v112_v29 = vsub.f32 4.0, %v1850_v6  ;;  %v113_v30 = vsub.f32 4.0, %v1852_v7  ;;  %v114_v31 = vsub.f32 4.0, %v1854_v8  ;;  %v115_v32 = vsub.f32 4.0, %v1856_v9 }
  0x28   :  { %v116_v33 = vsub.f32 4.0, %v1858_v10  ;;  %v117_v34 = vsub.f32 4.0, %v1860_v23  ;;  %v118_v35 = vsub.f32 4.0, %v1862_v24  ;;  %v119_v36 = vsub.f32 4.0, %v1864_v12 }
  0x29   :  { %v150_v38 = vmul.f32 %v1580_v37, %v1866_v13  ;;  %v151_v39 = vmul.f32 %v1580_v37, %v1868_v14  ;;  %v152_v40 = vmul.f32 %v1580_v37, %v1870_v15  ;;  %v153_v41 = vmul.f32 %v1580_v37, %v1872_v16 }
  0x2a   :  { %v154_v43 = vmul.f32 %v1580_v37, %v1874_v17  ;;  %v155_v44 = vmul.f32 %v1580_v37, %v1876_v18  ;;  %v156_v45 = vmul.f32 %v1580_v37, %v1878_v19  ;;  %v157_v46 = vmul.f32 %v1580_v37, %v1880_v20 }
  0x2b   :  { %v158_v47 = vmul.f32 %v1580_v37, %v1882_v21  ;;  %v159_v48 = vmul.f32 %v1580_v37, %v1884_v22  ;;  %v160_v49 = vmul.f32 %v1580_v37, %v1886_v25  ;;  %v161_v50 = vmul.f32 %v1581_v42, %v109_v26 }
  0x2c   :  { %v162_v51 = vmul.f32 %v1581_v42, %v110_v27  ;;  %v163_v52 = vmul.f32 %v1581_v42, %v111_v28  ;;  %v164_v53 = vmul.f32 %v1581_v42, %v112_v29  ;;  %v165_v54 = vmul.f32 %v1581_v42, %v113_v30 }
  0x2d   :  { %v166_v55 = vmul.f32 %v1581_v42, %v114_v31  ;;  %v167_v56 = vmul.f32 %v1581_v42, %v115_v32  ;;  %v168_v57 = vmul.f32 %v1581_v42, %v116_v33  ;;  %v169_v58 = vmul.f32 %v1581_v42, %v117_v34 }
  0x2e   :  { %v170_v59 = vmul.f32 %v1581_v42, %v118_v35  ;;  %v171_v60 = vmul.f32 %v1581_v42, %v119_v36  ;;  %v1910_v61 = vadd.f32 %v161_v50, %v150_v38  ;;  %v1912_v62 = vadd.f32 %v162_v51, %v151_v39 }
  0x2f   :  { %v1914_v63 = vadd.f32 %v163_v52, %v152_v40  ;;  %v1916_v0 = vadd.f32 %v164_v53, %v153_v41  ;;  %v1918_v1 = vadd.f32 %v165_v54, %v154_v43  ;;  %v1920_v2 = vadd.f32 %v166_v55, %v155_v44 }
  0x30   :  { %v1922_v3 = vadd.f32 %v167_v56, %v156_v45  ;;  %v1924_v4 = vadd.f32 %v168_v57, %v157_v46  ;;  %v1926_v5 = vadd.f32 %v169_v58, %v158_v47  ;;  %v1928_v6 = vadd.f32 %v170_v59, %v159_v48 }
  0x31   :  { %v1930_v7 = vadd.f32 %v171_v60, %v160_v49  ;;  %v183_v8 = vmul.f32 %v1580_v37, %v109_v26  ;;  %v184_v9 = vmul.f32 %v1580_v37, %v110_v27  ;;  %v185_v10 = vmul.f32 %v1580_v37, %v111_v28 }
  0x32   :  { %v186_v23 = vmul.f32 %v1580_v37, %v112_v29  ;;  %v187_v24 = vmul.f32 %v1580_v37, %v113_v30  ;;  %v188_v12 = vmul.f32 %v1580_v37, %v114_v31  ;;  %v189_v38 = vmul.f32 %v1580_v37, %v115_v32  ;;  %v1582_v30 = vld [vmem:[#allocation2 + $0x2] ss:$0 sm:$0xff] }
  0x33   :  { %v190_v39 = vmul.f32 %v1580_v37, %v116_v33  ;;  %v191_v40 = vmul.f32 %v1580_v37, %v117_v34  ;;  %v192_v41 = vmul.f32 %v1580_v37, %v118_v35  ;;  %v193_v43 = vmul.f32 %v1580_v37, %v119_v36 }
  0x34   :  { %v194_v44 = vmul.f32 %v1581_v42, %v1866_v13  ;;  %v195_v45 = vmul.f32 %v1581_v42, %v1868_v14  ;;  %v196_v46 = vmul.f32 %v1581_v42, %v1870_v15  ;;  %v197_v47 = vmul.f32 %v1581_v42, %v1872_v16 }
  0x35   :  { %v198_v26 = vmul.f32 %v1581_v42, %v1874_v17  ;;  %v199_v27 = vmul.f32 %v1581_v42, %v1876_v18  ;;  %v200_v28 = vmul.f32 %v1581_v42, %v1878_v19  ;;  %v201_v29 = vmul.f32 %v1581_v42, %v1880_v20 }
  0x36   :  { %v202_v31 = vmul.f32 %v1581_v42, %v1882_v21  ;;  %v203_v32 = vmul.f32 %v1581_v42, %v1884_v22  ;;  %v204_v13 = vmul.f32 %v1581_v42, %v1886_v25  ;;  %v205_v14 = vsub.f32 %v183_v8, %v194_v44  ;;  %v1583_v8 = vld [vmem:[#allocation2 + $0x3] ss:$0 sm:$0xff] }
  0x37   :  { %v206_v33 = vsub.f32 %v184_v9, %v195_v45  ;;  %v207_v15 = vsub.f32 %v185_v10, %v196_v46  ;;  %v208_v34 = vsub.f32 %v186_v23, %v197_v47  ;;  %v209_v16 = vsub.f32 %v187_v24, %v198_v26 }
  0x38   :  { %v210_v35 = vsub.f32 %v188_v12, %v199_v27  ;;  %v211_v17 = vsub.f32 %v189_v38, %v200_v28  ;;  %v212_v36 = vsub.f32 %v190_v39, %v201_v29  ;;  %v213_v18 = vsub.f32 %v191_v40, %v202_v31 }
  0x39   :  { %v214_v37 = vsub.f32 %v192_v41, %v203_v32  ;;  %v215_v19 = vsub.f32 %v193_v43, %v204_v13  ;;  %v216_v48 = vmul.f32 %v1582_v30, %v205_v14  ;;  %v217_v20 = vmul.f32 %v1582_v30, %v206_v33 }
  0x3a   :  { %v218_v49 = vmul.f32 %v1582_v30, %v207_v15  ;;  %v219_v50 = vmul.f32 %v1582_v30, %v208_v34  ;;  %v220_v21 = vmul.f32 %v1582_v30, %v209_v16  ;;  %v221_v51 = vmul.f32 %v1582_v30, %v210_v35 }
  0x3b   :  { %v222_v22 = vmul.f32 %v1582_v30, %v211_v17  ;;  %v223_v52 = vmul.f32 %v1582_v30, %v212_v36  ;;  %v224_v25 = vmul.f32 %v1582_v30, %v213_v18  ;;  %v225_v42 = vmul.f32 %v1582_v30, %v214_v37 }
  0x3c   :  { %v226_v53 = vmul.f32 %v1582_v30, %v215_v19  ;;  %v227_v54 = vmul.f32 %v216_v48, %v205_v14  ;;  %v228_v55 = vmul.f32 %v217_v20, %v206_v33  ;;  %v229_v56 = vmul.f32 %v218_v49, %v207_v15 }
  0x3d   :  { %v230_v57 = vmul.f32 %v219_v50, %v208_v34  ;;  %v231_v58 = vmul.f32 %v220_v21, %v209_v16  ;;  %v232_v59 = vmul.f32 %v221_v51, %v210_v35  ;;  %v233_v60 = vmul.f32 %v222_v22, %v211_v17 }
  0x3e   :  { %v234_v9 = vmul.f32 %v223_v52, %v212_v36  ;;  %v235_v10 = vmul.f32 %v224_v25, %v213_v18  ;;  %v236_v23 = vmul.f32 %v225_v42, %v214_v37  ;;  %v237_v24 = vmul.f32 %v226_v53, %v215_v19 }
  0x3f   :  { %v238_v12 = vadd.f32 %v227_v54, %v1910_v61  ;;  %v239_v38 = vadd.f32 %v228_v55, %v1912_v62  ;;  %v240_v39 = vadd.f32 %v229_v56, %v1914_v63  ;;  %v1947_v40 = vadd.f32 %v230_v57, %v1916_v0 }
  0x40   :  { %v1950_v41 = vadd.f32 %v231_v58, %v1918_v1  ;;  %v1953_v43 = vadd.f32 %v232_v59, %v1920_v2  ;;  %v1956_v44 = vadd.f32 %v233_v60, %v1922_v3  ;;  %v1959_v45 = vadd.f32 %v234_v9, %v1924_v4  ;;  %v2008_v58 = vld [vmem:[#allocation2 + $0x4] ss:$0 sm:$0xff] }
  0x41   :  { %v1962_v61 = vadd.f32 %v235_v10, %v1926_v5  ;;  %v1965_v62 = vadd.f32 %v236_v23, %v1928_v6  ;;  %v1968_v63 = vadd.f32 %v237_v24, %v1930_v7  ;;  %v249_v0 = vmul.f32 %v1583_v8, %v205_v14 }
  0x42   :  { %v250_v1 = vmul.f32 %v1583_v8, %v206_v33  ;;  %v251_v46 = vmul.f32 %v1583_v8, %v207_v15  ;;  %v252_v2 = vmul.f32 %v1583_v8, %v208_v34  ;;  %v253_v47 = vmul.f32 %v1583_v8, %v209_v16 }
  0x43   :  { %v254_v26 = vmul.f32 %v1583_v8, %v210_v35  ;;  %v255_v3 = vmul.f32 %v1583_v8, %v211_v17  ;;  %v256_v27 = vmul.f32 %v1583_v8, %v212_v36  ;;  %v257_v28 = vmul.f32 %v1583_v8, %v213_v18 }
  0x44   :  { %v258_v4 = vmul.f32 %v1583_v8, %v214_v37  ;;  %v259_v29 = vmul.f32 %v1583_v8, %v215_v19  ;;  %v260_v30 = vmul.f32 %v238_v12, %v238_v12  ;;  %v261_v5 = vmul.f32 %v239_v38, %v239_v38 }
  0x45   :  { %v262_v31 = vmul.f32 %v240_v39, %v240_v39  ;;  %v263_v6 = vmul.f32 %v1947_v40, %v1947_v40  ;;  %v264_v7 = vmul.f32 %v1950_v41, %v1950_v41  ;;  %v265_v32 = vmul.f32 %v1953_v43, %v1953_v43 }
  0x46   :  { %v266_v13 = vmul.f32 %v1956_v44, %v1956_v44  ;;  %v267_v14 = vmul.f32 %v1959_v45, %v1959_v45  ;;  %v268_v33 = vmul.f32 %v1962_v61, %v1962_v61  ;;  %v269_v15 = vmul.f32 %v1965_v62, %v1965_v62 }
  0x47   :  { %v270_v34 = vmul.f32 %v1968_v63, %v1968_v63  ;;  %v271_v16 = vmul.f32 %v249_v0, %v249_v0  ;;  %v272_v35 = vmul.f32 %v250_v1, %v250_v1  ;;  %v273_v17 = vmul.f32 %v251_v46, %v251_v46 }
  0x48   :  { %v274_v36 = vmul.f32 %v252_v2, %v252_v2  ;;  %v275_v18 = vmul.f32 %v253_v47, %v253_v47  ;;  %v276_v37 = vmul.f32 %v254_v26, %v254_v26  ;;  %v277_v19 = vmul.f32 %v255_v3, %v255_v3 }
  0x49   :  { %v278_v48 = vmul.f32 %v256_v27, %v256_v27  ;;  %v279_v20 = vmul.f32 %v257_v28, %v257_v28  ;;  %v280_v49 = vmul.f32 %v258_v4, %v258_v4  ;;  %v281_v50 = vmul.f32 %v259_v29, %v259_v29 }
  0x4a   :  { %v1986_v21 = vadd.f32 %v271_v16, %v260_v30  ;;  %v1988_v51 = vadd.f32 %v272_v35, %v261_v5  ;;  %v1990_v22 = vadd.f32 %v273_v17, %v262_v31  ;;  %v1992_v52 = vadd.f32 %v274_v36, %v263_v6 }
  0x4b   :  { %v1994_v25 = vadd.f32 %v275_v18, %v264_v7  ;;  %v1996_v42 = vadd.f32 %v276_v37, %v265_v32  ;;  %v1998_v53 = vadd.f32 %v277_v19, %v266_v13  ;;  %v2000_v54 = vadd.f32 %v278_v48, %v267_v14 }
  0x4c   :  { %v2002_v55 = vadd.f32 %v279_v20, %v268_v33  ;;  %v2004_v56 = vadd.f32 %v280_v49, %v269_v15  ;;  %v2006_v57 = vadd.f32 %v281_v50, %v270_v34  ;;  %v2011_v59 = vmul.f32 %v2008_v58, %v238_v12 }
  0x4d   :  { %v2014_v60 = vmul.f32 %v2008_v58, %v239_v38  ;;  %v2020_v24 = vmul.f32 %v2008_v58, %v240_v39  ;;  %v293_v28 = vsub.f32 0.0, %v1986_v21  ;;  %v294_v39 = vsub.f32 0.0, %v1988_v51 }
  0x4e   :  { %3180 = vst [vmem:[#allocation6_spill] sm:$0xff] %v2004_v56  ;;  %3181 = vst [vmem:[#allocation7_spill] sm:$0xff] %v2006_v57  ;;  %v3160_v8 = vand.u32 2147483647, %v2011_v59  ;;  %v351_v9 = vand.u32 2139095040, %v2011_v59  ;;  %v295_v4 = vsub.f32 0.0, %v1990_v22 }
  0x4f   :  { %v3159_v10 = vand.u32 2147483647, %v2014_v60  ;;  %v454_v1 = vand.u32 2139095040, %v2014_v60  ;;  %v557_v27 = vand.u32 2139095040, %v2020_v24  ;;  %v3176_v15 = vmov 683565275  }
  0x50   :  { %v352_v23 = vshrl.u32 %v351_v9, 23  ;;  %v355_v0 = vand.u32 8388607, %v3160_v8  ;;  %v3172_v16 = vmov 2475754826   ;;  %v3183_v51 = vsub.f32 0.0, %v1994_v25 }
  0x51   :  { %v458_v12 = vand.u32 8388607, %v3159_v10  ;;  %v455_v46 = vshrl.u32 %v454_v1, 23  ;;  %v2037_v14 = vshrl.u32 %v557_v27, 23  ;;  %v3170_v17 = vmov 2131351028  }
  0x52   :  { %v1586_v38 = vadd.s32 4294967169, %v352_v23  ;;  %v356_v47 = vor.u32 8388608, %v355_v0  ;;  %v3162_v18 = vmov 2102212464   ;;  %v3167_v19 = vmov 920167782  }
  0x53   :  { %v1590_v26 = vadd.s32 4294967169, %v455_v46  ;;  %v459_v3 = vor.u32 8388608, %v458_v12  ;;  %v3165_v0 = vmov 1326507024  }
  0x54   :  { %v358_v2 = vadd.s32 1, %v1586_v38  ;;  %v2033_v32 = vshll.u32 %v356_v47, 8 }
  0x55   :  { %v461_v30 = vadd.s32 1, %v1590_v26  ;;  %v2035_v13 = vshll.u32 %v459_v3, 8 }
  0x56   :  { %vm359_vm0 = vcmp.gt.s32.totalorder %v358_v2, 0 }
  0x57   :  { %v360_v29 = vsel %vm359_vm0, %v358_v2, 0  ;;  %vm462_vm1 = vcmp.gt.s32.totalorder %v461_v30, 0 }
  0x58   :  { %v361_v6 = vshrl.u32 %v360_v29, 5  ;;  %v362_v7 = vand.u32 31, %v360_v29  ;;  %v463_v2 = vsel %vm462_vm1, %v461_v30, 0 }
  0x59   :  { %v464_v3 = vshrl.u32 %v463_v2, 5  ;;  %v465_v27 = vand.u32 31, %v463_v2 }
  0x5a   :  { %v363_v33 = vsub.s32 32, %v362_v7  ;;  %v365_v34 = vshll.u32 %v3176_v15, %v362_v7  ;;  %v368_v35 = vshll.u32 %v3172_v16, %v362_v7  ;;  %v371_v36 = vshll.u32 %v3170_v17, %v362_v7 }
  0x5b   :  { %v374_v37 = vshll.u32 %v3162_v18, %v362_v7  ;;  %v377_v48 = vshll.u32 %v3167_v19, %v362_v7  ;;  %vm380_vm2 = vcmp.lt.s32.totalorder %v361_v6, 1  ;;  %vm381_vm3 = vcmp.lt.s32.totalorder %v361_v6, 2 }
  0x5c   :  { %v364_v20 = vshrl.u32 %v3176_v15, %v363_v33  ;;  %v366_v49 = vshrl.u32 %v3172_v16, %v363_v33  ;;  %v369_v50 = vshrl.u32 %v3170_v17, %v363_v33  ;;  %v372_v9 = vshrl.u32 %v3162_v18, %v363_v33 }
  0x5d   :  { %v375_v23 = vshrl.u32 %v3167_v19, %v363_v33  ;;  %v378_v1 = vshrl.u32 %v3165_v0, %v363_v33  ;;  %vm382_vm4 = vcmp.lt.s32.totalorder %v361_v6, 3  ;;  %vm383_vm5 = vcmp.lt.s32.totalorder %v361_v6, 4 }
  0x5e   :  { %v367_v12 = vor.u32 %v366_v49, %v365_v34  ;;  %v370_v38 = vor.u32 %v369_v50, %v368_v35  ;;  %v373_v46 = vor.u32 %v372_v9, %v371_v36  ;;  %v466_v34 = vsub.s32 32, %v465_v27 }
  0x5f   :  { %v376_v47 = vor.u32 %v375_v23, %v374_v37  ;;  %v379_v26 = vor.u32 %v378_v1, %v377_v48  ;;  %v468_v37 = vshll.u32 %v3176_v15, %v465_v27  ;;  %v480_v2 = vshll.u32 %v3167_v19, %v465_v27 }
  0x60   :  { %v384_v29 = vsel %vm380_vm2, %v364_v20, %v367_v12  ;;  %v385_v7 = vsel %vm383_vm5, %v373_v46, 2102212464  ;;  %v388_v10 = vsel %vm380_vm2, %v367_v12, %v370_v38  ;;  %v392_v8 = vsel %vm380_vm2, %v370_v38, %v373_v46 }
  0x61   :  { %v386_v33 = vsel %vm382_vm4, %v370_v38, %v385_v7  ;;  %v389_v31 = vsel %vm383_vm5, %v376_v47, 920167782  ;;  %v393_v5 = vsel %vm383_vm5, %v379_v26, 1326507024  ;;  %v467_v50 = vshrl.u32 %v3176_v15, %v466_v34 }
  0x62   :  { %v387_v35 = vsel %vm381_vm3, %v384_v29, %v386_v33  ;;  %v390_v30 = vsel %vm382_vm4, %v373_v46, %v389_v31  ;;  %v394_v36 = vsel %vm382_vm4, %v376_v47, %v393_v5  ;;  %v469_v5 = vshrl.u32 %v3172_v16, %v466_v34 }
  0x63   :  { %v391_v48 = vsel %vm381_vm3, %v388_v10, %v390_v30  ;;  %v395_v20 = vsel %vm381_vm3, %v392_v8, %v394_v36  ;;  %v403_v49 = vmul.u32 %v2033_v32, %v387_v35  ;;  %v471_v31 = vshll.u32 %v3172_v16, %v465_v27 }
  0x64   :  { %v2064_v9 = vmul.u32.u64.low %v2033_v32, %v395_v20  ;;  %v2065_v23 = vmul.u32.u64.high %v2033_v32, %v395_v20, %v2064_v9  ;;  %v2068_v1 = vmul.u32.u64.low %v2033_v32, %v391_v48  ;;  %v2069_v12 = vmul.u32.u64.high %v2033_v32, %v391_v48, %v2068_v1 }
  0x65   :  { %v472_v10 = vshrl.u32 %v3170_v17, %v466_v34  ;;  %v474_v8 = vshll.u32 %v3170_v17, %v465_v27  ;;  %v475_v6 = vshrl.u32 %v3162_v18, %v466_v34  ;;  %v477_v38 = vshll.u32 %v3162_v18, %v465_v27 }
  0x66   :  { %v478_v46 = vshrl.u32 %v3167_v19, %v466_v34  ;;  %v470_v47 = vor.u32 %v469_v5, %v468_v37  ;;  %v481_v26 = vshrl.u32 %v3165_v0, %v466_v34  ;;  %vm483_vm6 = vcmp.lt.s32.totalorder %v464_v3, 1 }
  0x67   :  { %v473_v32 = vor.u32 %v472_v10, %v471_v31  ;;  %vm405_vm7 = vc.u32 %v2065_v23, %v2068_v1  ;;  %v406_v29 = vadd.s32 1, %v2069_v12  ;;  %v476_v7 = vor.u32 %v475_v6, %v474_v8 }
  0x68   :  { %v1594_v33 = vadd.s32 4294967169, %v2037_v14  ;;  %v479_v35 = vor.u32 %v478_v46, %v477_v38  ;;  %v482_v30 = vor.u32 %v481_v26, %v480_v2  ;;  %vm484_vm8 = vcmp.lt.s32.totalorder %v464_v3, 2  ;;  %v1585_v38 = vld [vmem:[#allocation2 + $0x5] ss:$0 sm:$0xff] }
  0x69   :  { %vm485_vm9 = vcmp.lt.s32.totalorder %v464_v3, 3  ;;  %v407_v36 = vsel %vm405_vm7, %v406_v29, %v2069_v12  ;;  %vm486_vm10 = vcmp.lt.s32.totalorder %v464_v3, 4  ;;  %v487_v27 = vsel %vm483_vm6, %v467_v50, %v470_v47 }
  0x6a   :  { %v491_v34 = vsel %vm483_vm6, %v470_v47, %v473_v32  ;;  %v408_v37 = vadd.s32 %v407_v36, %v403_v49  ;;  %v488_v48 = vsel %vm486_vm10, %v476_v7, 2102212464  ;;  %v492_v20 = vsel %vm486_vm10, %v479_v35, 920167782 }
  0x6b   :  { %v495_v9 = vsel %vm483_vm6, %v473_v32, %v476_v7  ;;  %v489_v5 = vsel %vm485_vm9, %v473_v32, %v488_v48  ;;  %v493_v14 = vsel %vm485_vm9, %v476_v7, %v492_v20  ;;  %v496_v31 = vsel %vm486_vm10, %v482_v30, 1326507024 }
  0x6c   :  { %v564_v10 = vadd.s32 1, %v1594_v33  ;;  %v298_v8 = vsub.f32 0.0, %v1996_v42  ;;  %v409_v6 = vadd.s32 536870912, %v408_v37  ;;  %v494_v12 = vsel %vm484_vm8, %v491_v34, %v493_v14 }
  0x6d   :  { %v497_v50 = vsel %vm485_vm9, %v479_v35, %v496_v31  ;;  %v490_v49 = vsel %vm484_vm8, %v487_v27, %v489_v5  ;;  %v2097_v2 = vmul.u32.u64.low %v2035_v13, %v494_v12  ;;  %v2098_v47 = vmul.u32.u64.high %v2035_v13, %v494_v12, %v2097_v2 }
  0x6e   :  { %v498_v46 = vsel %vm484_vm8, %v495_v9, %v497_v50  ;;  %v2101_v32 = vshrl.u32 %v409_v6, 30  ;;  %vm565_vm11 = vcmp.gt.s32.totalorder %v564_v10, 0  ;;  %v299_v29 = vsub.f32 0.0, %v1998_v53 }
  0x6f   :  { %v2104_v26 = vmul.u32.u64.low %v2035_v13, %v498_v46  ;;  %v2105_v42 = vmul.u32.u64.high %v2035_v13, %v498_v46, %v2104_v26  ;;  %v300_v7 = vsub.f32 0.0, %v2000_v54  ;;  %v301_v33 = vsub.f32 0.0, %v2002_v55 }
  0x70   :  { %v566_v3 = vsel %vm565_vm11, %v564_v10, 0  ;;  %v304_v35 = vmul.f32 %v1585_v38, %v293_v28  ;;  %v411_v30 = vshll.u32 %v2101_v32, 30  ;;  %v506_v36 = vmul.u32 %v2035_v13, %v490_v49 }
  0x71   :  { %v568_v27 = vand.u32 31, %v566_v3  ;;  %v305_v34 = vmul.f32 %v1585_v38, %v294_v39  ;;  %v2118_v48 = vmul.f32 %v2008_v58, %v1947_v40  ;;  %v509_v53 = vadd.s32 1, %v2098_v47 }
  0x72   :  { %v3161_v54 = vand.u32 2147483647, %v2020_v24  ;;  %v306_v21 = vmul.f32 %v1585_v38, %v295_v4  ;;  %v3182_v55 = vsub.f32 0.0, %v1992_v52  ;;  %v2126_v20 = vsub.s32 %v408_v37, %v411_v30 }
  0x73   :  { %vm508_vm12 = vc.u32 %v2105_v42, %v2097_v2  ;;  %v308_v39 = vmul.f32 %v1585_v38, %v3183_v51  ;;  %v309_v40 = vmul.f32 %v1585_v38, %v298_v8  ;;  %v569_v9 = vsub.s32 32, %v568_v27 }
  0x74   :  { %v307_v28 = vmul.f32 %v1585_v38, %v3182_v55  ;;  %v510_v13 = vsel %vm508_vm12, %v509_v53, %v2098_v47  ;;  %v2133_v5 = vmul.f32 %v1585_v38, %v299_v29  ;;  %v2135_v14 = vmul.f32 %v1585_v38, %v300_v7 }
  0x75   :  { %v414_v22 = vsub.s32 0, %v2126_v20  ;;  %v511_v52 = vadd.s32 %v510_v13, %v506_v36  ;;  %v2138_v4 = vmul.f32 %v1585_v38, %v301_v33  ;;  %v2140_v37 = vmul.f32 1.442695, %v304_v35 }
  0x76   :  { %v561_v31 = vand.u32 8388607, %v3161_v54  ;;  %v660_v25 = vand.u32 2139095040, %v2118_v48  ;;  %v567_v8 = vshrl.u32 %v566_v3, 5  ;;  %v571_v6 = vshll.u32 %v3176_v15, %v568_v27 }
  0x77   :  { %v1587_v10 = vmin.u32 %v414_v22, %v2126_v20  ;;  %v574_v12 = vshll.u32 %v3172_v16, %v568_v27  ;;  %v512_v50 = vadd.s32 536870912, %v511_v52  ;;  %v572_v49 = vshrl.u32 %v3172_v16, %v569_v9 }
  0x78   :  { %v575_v38 = vshrl.u32 %v3170_v17, %v569_v9  ;;  %v577_v46 = vshll.u32 %v3170_v17, %v568_v27  ;;  %v578_v26 = vshrl.u32 %v3162_v18, %v569_v9  ;;  %v580_v29 = vshll.u32 %v3162_v18, %v568_v27 }
  0x79   :  { %v416_v47 = vclz %v1587_v10  ;;  %v581_v7 = vshrl.u32 %v3167_v19, %v569_v9  ;;  %v317_v33 = vmul.f32 1.442695, %v305_v34  ;;  %v2154_v3 = vmul.f32 1.442695, %v306_v21 }
  0x7a   :  { %v2156_v35 = vshrl.u32 %v512_v50, 30  ;;  %v562_v30 = vor.u32 8388608, %v561_v31  ;;  %v583_v53 = vshll.u32 %v3167_v19, %v568_v27  ;;  %v584_v55 = vshrl.u32 %v3165_v0, %v569_v9 }
  0x7b   :  { %v1588_v36 = vadd.s32 4294967294, %v416_v47  ;;  %v661_v51 = vshrl.u32 %v660_v25, 23  ;;  %v573_v22 = vor.u32 %v572_v49, %v571_v6  ;;  %v576_v10 = vor.u32 %v575_v38, %v574_v12 }
  0x7c   :  { %v514_v13 = vshll.u32 %v2156_v35, 30  ;;  %v582_v54 = vor.u32 %v581_v7, %v580_v29  ;;  %v579_v18 = vor.u32 %v578_v26, %v577_v46  ;;  %vm586_vm14 = vcmp.lt.s32.totalorder %v567_v8, 1 }
  0x7d   :  { %vm1589_vm13 = vcmp.lt.s32.totalorder %v1588_v36, 0  ;;  %vm589_vm15 = vcmp.lt.s32.totalorder %v567_v8, 4  ;;  %v321_v34 = vmul.f32 1.442695, %v307_v28  ;;  %v570_v31 = vshrl.u32 %v3176_v15, %v569_v9 }
  0x7e   :  { %v2161_v21 = vsub.s32 %v511_v52, %v514_v13  ;;  %vm588_vm0 = vcmp.lt.s32.totalorder %v567_v8, 3  ;;  %v585_v50 = vor.u32 %v584_v55, %v583_v53  ;;  %vm587_vm1 = vcmp.lt.s32.totalorder %v567_v8, 2 }
  0x7f   :  { %v591_v27 = vsel %vm589_vm15, %v579_v18, 2102212464  ;;  %v602_v25 = vshll.u32 %v562_v30, 8  ;;  %v419_v47 = vsel %vm1589_vm13, 0, %v1588_v36  ;;  %v594_v12 = vsel %vm586_vm14, %v573_v22, %v576_v10 }
  0x80   :  { %v517_v6 = vsub.s32 0, %v2161_v21  ;;  %v595_v49 = vsel %vm589_vm15, %v582_v54, 920167782  ;;  %v2168_v38 = vmul.f32 1.442695, %v308_v39  ;;  %v1598_v9 = vadd.s32 4294967169, %v661_v51 }
  0x81   :  { %v2170_v28 = vmul.f32 1.442695, %v309_v40  ;;  %v596_v52 = vsel %vm588_vm0, %v579_v18, %v595_v49  ;;  %v590_v26 = vsel %vm586_vm14, %v570_v31, %v573_v22  ;;  %v592_v29 = vsel %vm588_vm0, %v576_v10, %v591_v27 }
  0x82   :  { %v1591_v46 = vmin.u32 %v517_v6, %v2161_v21  ;;  %v598_v7 = vsel %vm586_vm14, %v576_v10, %v579_v18  ;;  %v424_v30 = vsub.s32 4294967266, %v419_v47  ;;  %v597_v36 = vsel %vm587_vm1, %v594_v12, %v596_v52 }
  0x83   :  { %v599_v53 = vsel %vm589_vm15, %v585_v50, 1326507024  ;;  %v3164_v39 = vand.u32 2147483647, %v2118_v48  ;;  %v2181_v13 = vmul.u32.u64.low %v602_v25, %v597_v36  ;;  %v2182_v51 = vmul.u32.u64.high %v602_v25, %v597_v36, %v2181_v13 }
  0x84   :  { %v519_v40 = vclz %v1591_v46  ;;  %v600_v55 = vsel %vm588_vm0, %v582_v54, %v599_v53  ;;  %v404_v22 = vadd.s32 %v2068_v1, %v2065_v23  ;;  %v420_v31 = vsub.s32 32, %v419_v47 }
  0x85   :  { %v593_v18 = vsel %vm587_vm1, %v590_v26, %v592_v29  ;;  %v601_v10 = vsel %vm587_vm1, %v598_v7, %v600_v55  ;;  %v667_v12 = vadd.s32 1, %v1598_v9  ;;  %1692 = vpow2.f32 %v2140_v37 }
  0x86   :  { %v1592_v27 = vadd.s32 4294967294, %v519_v40  ;;  %v2189_v6 = vmul.u32.u64.low %v602_v25, %v601_v10  ;;  %v2190_v50 = vmul.u32.u64.high %v602_v25, %v601_v10, %v2189_v6  ;;  %v2194_v54 = vmul.f32 1.442695, %v2133_v5 }
  0x87   :  { %v2197_v49 = vmul.f32 1.442695, %v2135_v14  ;;  %v425_v52 = vadd.s32 127, %v424_v30  ;;  %v2200_v23 = vmul.f32 1.442695, %v2138_v4  ;;  %v612_v1 = vadd.s32 1, %v2182_v51 }
  0x88   :  { %vm1593_vm2 = vcmp.lt.s32.totalorder %v1592_v27, 0  ;;  %vm668_vm3 = vcmp.gt.s32.totalorder %v667_v12, 0  ;;  %1694 = vpow2.f32 %v317_v33  ;;  %v609_v46 = vmul.u32 %v602_v25, %v593_v18 }
  0x89   :  { %v522_v8 = vsel %vm1593_vm2, 0, %v1592_v27  ;;  %v669_v9 = vsel %vm668_vm3, %v667_v12, 0  ;;  %v421_v37 = vshll.u32 %v2126_v20, %v419_v47  ;;  %v422_v26 = vshrl.u32 %v404_v22, %v420_v31 }
  0x8a   :  { %v527_v5 = vsub.s32 4294967266, %v522_v8  ;;  %v664_v14 = vand.u32 8388607, %v3164_v39  ;;  %1696 = vpow2.f32 %v2154_v3  ;;  %v426_v29 = vshll.u32 %v425_v52, 23 }
  0x8b   :  { %vm611_vm4 = vc.u32 %v2190_v50, %v2181_v13  ;;  %v671_v4 = vand.u32 31, %v669_v9  ;;  %1698 = vpow2.f32 %v321_v34  ;;  %v2211_v33 = vmul.f32 %v2008_v58, %v1950_v41 }
  0x8c   :  { %v507_v20 = vadd.s32 %v2097_v2, %v2105_v42  ;;  %v613_v25 = vsel %vm611_vm4, %v612_v1, %v2182_v51  ;;  %v523_v47 = vsub.s32 32, %v522_v8  ;;  %v528_v7 = vadd.s32 127, %v527_v5 }
  0x8d   :  { %v614_v30 = vadd.s32 %v613_v25, %v609_v46  ;;  %v672_v36 = vsub.s32 32, %v671_v4  ;;  %v2218_v3 = vmul.f32 %v2008_v58, %v1953_v43  ;;  %v2222_v34 = vmul.f32 %v2008_v58, %v1956_v44 }
  0x8e   :  { %v423_v53 = vor.u32 %v422_v26, %v421_v37  ;;  %v665_v41 = vor.u32 8388608, %v664_v14  ;;  %v427_v40 = vor.u32 4788187, %v426_v29  ;;  %v674_v2 = vshll.u32 %v3176_v15, %v671_v4 }
  0x8f   :  { %v615_v55 = vadd.s32 536870912, %v614_v30  ;;  %v675_v42 = vshrl.u32 %v3172_v16, %v672_v36  ;;  %v524_v51 = vshll.u32 %v2161_v21, %v522_v8  ;;  %v677_v22 = vshll.u32 %v3172_v16, %v671_v4 }
  0x90   :  { %v678_v31 = vshrl.u32 %v3170_v17, %v672_v36  ;;  %v763_v43 = vand.u32 2139095040, %v2211_v33  ;;  %v525_v18 = vshrl.u32 %v507_v20, %v523_v47  ;;  %v529_v10 = vshll.u32 %v528_v7, 23 }
  0x91   :  { %v2230_v44 = vshrl.u32 %v615_v55, 30  ;;  %v670_v27 = vshrl.u32 %v669_v9, 5  ;;  %v680_v6 = vshll.u32 %v3170_v17, %v671_v4  ;;  %v3184_v12 = vmov 2102212464  }
  0x92   :  { %v681_v52 = vshrl.u32 %v3184_v12, %v672_v36  ;;  %v683_v1 = vshll.u32 %v3184_v12, %v671_v4  ;;  %v684_v46 = vshrl.u32 %v3167_v19, %v672_v36  ;;  %v428_v21 = vand.u32 2147483647, %v427_v40  ;;  %v2237_v5 = vpop.eup %1692 }
  0x93   :  { %v430_v8 = vcvt.s32.f32 %v423_v53  ;;  %v617_v37 = vshll.u32 %v2230_v44, 30  ;;  %v676_v26 = vor.u32 %v675_v42, %v674_v2  ;;  %v679_v14 = vor.u32 %v678_v31, %v677_v22 }
  0x94   :  { %v685_v29 = vor.u32 %v684_v46, %v683_v1  ;;  %v686_v20 = vshll.u32 %v3167_v19, %v671_v4  ;;  %v687_v9 = vshrl.u32 %v3165_v0, %v672_v36  ;;  %v526_v25 = vor.u32 %v525_v18, %v524_v51 }
  0x95   :  { %v530_v47 = vor.u32 4788187, %v529_v10  ;;  %v2241_v7 = vsub.s32 %v614_v30, %v617_v37  ;;  %vm689_vm5 = vcmp.lt.s32.totalorder %v670_v27, 1  ;;  %v2243_v55 = vpop.eup %1694  ;;  %v673_v53 = vshrl.u32 %v3176_v15, %v672_v36 }
  0x96   :  { %v682_v40 = vor.u32 %v681_v52, %v680_v6  ;;  %vm692_vm6 = vcmp.lt.s32.totalorder %v670_v27, 4  ;;  %v764_v2 = vshrl.u32 %v763_v43, 23  ;;  %vm690_vm7 = vcmp.lt.s32.totalorder %v670_v27, 2 }
  0x97   :  { %v620_v42 = vsub.s32 0, %v2241_v7  ;;  %vm691_vm8 = vcmp.lt.s32.totalorder %v670_v27, 3  ;;  %v705_v22 = vshll.u32 %v665_v41, 8  ;;  %v2247_v4 = vpop.eup %1696  ;;  %v688_v31 = vor.u32 %v687_v9, %v686_v20 }
  0x98   :  { %v694_v51 = vsel %vm692_vm6, %v682_v40, 2102212464  ;;  %v697_v30 = vsel %vm689_vm5, %v676_v26, %v679_v14  ;;  %v698_v18 = vsel %vm692_vm6, %v685_v29, 920167782  ;;  %v2252_v10 = vpop.eup %1698  ;;  %v2256_v36 = vmul.f32 %v2008_v58, %v1959_v45 }
  0x99   :  { %v531_v43 = vand.u32 2147483647, %v530_v47  ;;  %v533_v6 = vcvt.s32.f32 %v526_v25  ;;  %v1595_v52 = vmin.u32 %v620_v42, %v2241_v7  ;;  %v431_v41 = vmul.f32 %v430_v8, %v428_v21 }
  0x9a   :  { %v693_v1 = vsel %vm689_vm5, %v673_v53, %v676_v26  ;;  %v699_v46 = vsel %vm691_vm8, %v682_v40, %v698_v18  ;;  %v1602_v37 = vadd.s32 4294967169, %v764_v2  ;;  %v695_v9 = vsel %vm691_vm8, %v679_v14, %v694_v51 }
  0x9b   :  { %v622_v20 = vclz %v1595_v52  ;;  %v700_v39 = vsel %vm690_vm7, %v697_v30, %v699_v46  ;;  %v701_v0 = vsel %vm689_vm5, %v679_v14, %v682_v40  ;;  %v434_v45 = vsub.s32 4, %v2101_v32 }
  0x9c   :  { %v702_v47 = vsel %vm692_vm6, %v688_v31, 1326507024  ;;  %v2266_v25 = vmul.u32.u64.low %v705_v22, %v700_v39  ;;  %v2267_v19 = vmul.u32.u64.high %v705_v22, %v700_v39, %v2266_v25  ;;  %1700 = vpow2.f32 %v2168_v38 }
  0x9d   :  { %v534_v21 = vmul.f32 %v533_v6, %v531_v43  ;;  %v1596_v8 = vadd.s32 4294967294, %v622_v20  ;;  %v703_v26 = vsel %vm691_vm8, %v685_v29, %v702_v47  ;;  %v432_v53 = vxor.u32 2147483648, %v431_v41 }
  0x9e   :  { %v696_v2 = vsel %vm690_vm7, %v693_v1, %v695_v9  ;;  %v704_v42 = vsel %vm690_vm7, %v701_v0, %v703_v26  ;;  %v770_v14 = vadd.s32 1, %v1602_v37  ;;  %vm350_vm9 = vcmp.lt.s32.totalorder %v2011_v59, 0 }
  0x9f   :  { %vm1597_vm10 = vcmp.lt.s32.totalorder %v1596_v8, 0  ;;  %v2275_v40 = vmul.u32.u64.low %v705_v22, %v704_v42  ;;  %v2276_v31 = vmul.u32.u64.high %v705_v22, %v704_v42, %v2275_v40  ;;  %v2280_v39 = vmul.f32 %v2008_v58, %v1962_v61 }
  0xa0   :  { %v435_v38 = vsel %vm350_vm9, %v434_v45, %v2101_v32  ;;  %v715_v29 = vadd.s32 1, %v2267_v19  ;;  %vm771_vm11 = vcmp.gt.s32.totalorder %v770_v14, 0  ;;  %1702 = vpow2.f32 %v2170_v28 }
  0xa1   :  { %v535_v27 = vxor.u32 2147483648, %v534_v21  ;;  %v625_v0 = vsel %vm1597_vm10, 0, %v1596_v8  ;;  %v712_v51 = vmul.u32 %v705_v22, %v696_v2  ;;  %v3185_v30 = vand.u32 2147483647, %v2011_v59 }
  0xa2   :  { %v433_v43 = vsel %vm350_vm9, %v432_v53, %v431_v41  ;;  %vm453_vm13 = vcmp.lt.s32.totalorder %v2014_v60, 0  ;;  %v772_v61 = vsel %vm771_vm11, %v770_v14, 0  ;;  %v3188_v6 = vand.u32 2147483647, %v2014_v60 }
  0xa3   :  { %vm2287_vm12 = vcmp.le.f32.partialorder %v3185_v30, 0.7853982  ;;  %vm714_vm15 = vc.u32 %v2276_v31, %v2266_v25  ;;  %v3169_v22 = vand.u32 2147483647, %v2211_v33  ;;  %v610_v52 = vadd.s32 %v2181_v13, %v2190_v50 }
  0xa4   :  { %v437_v32 = vsel %vm2287_vm12, 0, %v435_v38  ;;  %vm2296_vm14 = vcmp.le.f32.partialorder %v3188_v6, 0.7853982  ;;  %v630_v41 = vsub.s32 4294967266, %v625_v0  ;;  %v716_v1 = vsel %vm714_vm15, %v715_v29, %v2267_v19 }
  0xa5   :  { %v774_v46 = vand.u32 31, %v772_v61  ;;  %v436_v37 = vsel %vm2287_vm12, %v2011_v59, %v433_v43  ;;  %v536_v20 = vsel %vm453_vm13, %v535_v27, %v534_v21  ;;  %v626_v9 = vsub.s32 32, %v625_v0 }
  0xa6   :  { %v717_v45 = vadd.s32 %v716_v1, %v712_v51  ;;  %1704 = vpow2.f32 %v2194_v54  ;;  %v2314_v47 = vmul.f32 %v2008_v58, %v1965_v62  ;;  %v2318_v13 = vmul.f32 %v2008_v58, %v1968_v63 }
  0xa7   :  { %v775_v19 = vsub.s32 32, %v774_v46  ;;  %v2320_v50 = vand.u32 3, %v437_v32  ;;  %v537_v8 = vsub.s32 4, %v2156_v35  ;;  %v767_v21 = vand.u32 8388607, %v3169_v22 }
  0xa8   :  { %v718_v26 = vadd.s32 536870912, %v717_v45  ;;  %1706 = vcosq.f32 %v436_v37  ;;  %v539_v54 = vsel %vm2296_vm14, %v2014_v60, %v536_v20  ;;  %v627_v62 = vshll.u32 %v2241_v7, %v625_v0 }
  0xa9   :  { %v631_v53 = vadd.s32 127, %v630_v41  ;;  %v628_v2 = vshrl.u32 %v610_v52, %v626_v9  ;;  %v773_v58 = vshrl.u32 %v772_v61, 5  ;;  %v777_v42 = vshll.u32 %v3176_v15, %v774_v46  ;;  %v2332_v14 = vpop.eup %1700 }
  0xaa   :  { %v2329_v63 = vshrl.u32 %v718_v26, 30  ;;  %v778_v40 = vshrl.u32 %v3172_v16, %v775_v19  ;;  %v780_v38 = vshll.u32 %v3172_v16, %v774_v46  ;;  %v781_v29 = vshrl.u32 %v3170_v17, %v775_v19 }
  0xab   :  { %v783_v27 = vshll.u32 %v3170_v17, %v774_v46  ;;  %v784_v7 = vshrl.u32 %v3184_v12, %v775_v19  ;;  %v786_v0 = vshll.u32 %v3184_v12, %v774_v46  ;;  %v3191_v30 = vmov 920167782  }
  0xac   :  { %v720_v51 = vshll.u32 %v2329_v63, 30  ;;  %v787_v18 = vshrl.u32 %v3191_v30, %v775_v19  ;;  %1708 = vsinq.f32 %v436_v37  ;;  %v538_v43 = vsel %vm453_vm13, %v537_v8, %v2156_v35 }
  0xad   :  { %v632_v61 = vshll.u32 %v631_v53, 23  ;;  %v789_v32 = vshll.u32 %v3191_v30, %v774_v46  ;;  %1710 = vcosq.f32 %v539_v54  ;;  %v629_v6 = vor.u32 %v628_v2, %v627_v62  ;;  %v2348_v1 = vpop.eup %1702 }
  0xae   :  { %v2346_v52 = vsub.s32 %v717_v45, %v720_v51  ;;  %v768_v41 = vor.u32 8388608, %v767_v21  ;;  %3192 = vst [vmem:[#allocation8_spill] sm:$0xff] %v2348_v1  ;;  %v776_v20 = vshrl.u32 %v3176_v15, %v775_v19  ;;  %v779_v9 = vor.u32 %v778_v40, %v777_v42 }
  0xaf   :  { %v782_v26 = vor.u32 %v781_v29, %v780_v38  ;;  %v3193_v22 = vmov 1326507024   ;;  %v785_v16 = vor.u32 %v784_v7, %v783_v27  ;;  %v788_v35 = vor.u32 %v787_v18, %v786_v0 }
  0xb0   :  { %v790_v37 = vshrl.u32 %v3193_v22, %v775_v19  ;;  %v723_v17 = vsub.s32 0, %v2346_v52  ;;  %vm792_vm0 = vcmp.lt.s32.totalorder %v773_v58, 1  ;;  %1712 = vsinq.f32 %v539_v54 }
  0xb1   :  { %v633_v46 = vor.u32 4788187, %v632_v61  ;;  %vm795_vm1 = vcmp.lt.s32.totalorder %v773_v58, 4  ;;  %v636_v45 = vcvt.s32.f32 %v629_v6  ;;  %vm794_vm2 = vcmp.lt.s32.totalorder %v773_v58, 3 }
  0xb2   :  { %v791_v8 = vor.u32 %v790_v37, %v789_v32  ;;  %v1599_v21 = vmin.u32 %v723_v17, %v2346_v52  ;;  %v808_v62 = vshll.u32 %v768_v41, 8  ;;  %vm793_vm3 = vcmp.lt.s32.totalorder %v773_v58, 2 }
  0xb3   :  { %v796_v53 = vsel %vm792_vm0, %v776_v20, %v779_v9  ;;  %v797_v2 = vsel %vm795_vm1, %v785_v16, 2102212464  ;;  %v800_v19 = vsel %vm792_vm0, %v779_v9, %v782_v26  ;;  %v2357_v42 = vpop.eup %1704  ;;  %v801_v38 = vsel %vm795_vm1, %v788_v35, 920167782 }
  0xb4   :  { %3194 = vst [vmem:[#allocation9_spill] sm:$0xff] %v2357_v42  ;;  %v725_v40 = vclz %v1599_v21  ;;  %v798_v54 = vsel %vm794_vm2, %v782_v26, %v797_v2  ;;  %v804_v29 = vsel %vm792_vm0, %v782_v26, %v785_v16  ;;  %v634_v27 = vand.u32 2147483647, %v633_v46 }
  0xb5   :  { %v802_v17 = vsel %vm794_vm2, %v785_v16, %v801_v38  ;;  %v805_v51 = vsel %vm795_vm1, %v791_v8, 1326507024  ;;  %v866_v7 = vand.u32 2139095040, %v2218_v3  ;;  %v1707_v0 = vpop.eup %1706  ;;  %v799_v61 = vsel %vm793_vm3, %v796_v53, %v798_v54 }
  0xb6   :  { %v1600_v18 = vadd.s32 4294967294, %v725_v40  ;;  %v803_v32 = vsel %vm793_vm3, %v800_v19, %v802_v17  ;;  %v806_v6 = vsel %vm794_vm2, %v788_v35, %v805_v51  ;;  %v540_v16 = vsel %vm2296_vm14, 0, %v538_v43 }
  0xb7   :  { %v807_v41 = vsel %vm793_vm3, %v804_v29, %v806_v6  ;;  %v2369_v20 = vmul.u32.u64.low %v808_v62, %v803_v32  ;;  %v2370_v9 = vmul.u32.u64.high %v808_v62, %v803_v32, %v2369_v20  ;;  %v867_v26 = vshrl.u32 %v866_v7, 23 }
  0xb8   :  { %vm556_vm4 = vcmp.lt.s32.totalorder %v2020_v24, 0  ;;  %vm1601_vm5 = vcmp.lt.s32.totalorder %v1600_v18, 0  ;;  %v2376_v37 = vmul.u32.u64.low %v808_v62, %v807_v41  ;;  %v2377_v46 = vmul.u32.u64.high %v808_v62, %v807_v41, %v2376_v37 }
  0xb9   :  { %vm443_vm6 = vcmp.eq.s32.totalorder %v2320_v50, 0  ;;  %vm446_vm7 = vcmp.eq.s32.totalorder %v2320_v50, 2  ;;  %v728_v58 = vsel %vm1601_vm5, 0, %v1600_v18  ;;  %v1606_v35 = vadd.s32 4294967169, %v867_v26  ;;  %v1709_v8 = vpop.eup %1708 }
  0xba   :  { %v713_v21 = vadd.s32 %v2266_v25, %v2276_v31  ;;  %v729_v53 = vsub.s32 32, %v728_v58  ;;  %v733_v2 = vsub.s32 4294967266, %v728_v58  ;;  %v815_v28 = vmul.u32 %v808_v62, %v799_v61  ;;  %v1711_v43 = vpop.eup %1710 }
  0xbb   :  { %v2383_v19 = vand.u32 3, %v540_v16  ;;  %v637_v40 = vmul.f32 %v636_v45, %v634_v27  ;;  %v818_v54 = vadd.s32 1, %v2370_v9  ;;  %v873_v38 = vadd.s32 1, %v1606_v35 }
  0xbc   :  { %v447_v29 = vxor.u32 2147483648, %v1707_v0  ;;  %v640_v17 = vsub.s32 4, %v2230_v44  ;;  %v734_v51 = vadd.s32 127, %v733_v2  ;;  %vm817_vm8 = vc.u32 %v2377_v46, %v2369_v20 }
  0xbd   :  { %v444_v7 = vxor.u32 2147483648, %v1709_v8  ;;  %v819_v25 = vsel %vm817_vm8, %v818_v54, %v2370_v9  ;;  %v3174_v31 = vand.u32 2147483647, %v2218_v3  ;;  %vm874_vm9 = vcmp.gt.s32.totalorder %v873_v38, 0  ;;  %v1713_v62 = vpop.eup %1712 }
  0xbe   :  { %v730_v18 = vshll.u32 %v2346_v52, %v728_v58  ;;  %v731_v45 = vshrl.u32 %v713_v21, %v729_v53  ;;  %v820_v27 = vadd.s32 %v819_v25, %v815_v28  ;;  %v875_v61 = vsel %vm874_vm9, %v873_v38, 0 }
  0xbf   :  { %v550_v32 = vxor.u32 2147483648, %v1711_v43  ;;  %v638_v6 = vxor.u32 2147483648, %v637_v40  ;;  %v735_v41 = vshll.u32 %v734_v51, 23  ;;  %v877_v26 = vand.u32 31, %v875_v61 }
  0xc0   :  { %vm546_vm10 = vcmp.eq.s32.totalorder %v2383_v19, 0  ;;  %vm549_vm11 = vcmp.eq.s32.totalorder %v2383_v19, 2  ;;  %v3195_v16 = vand.u32 2147483647, %v2020_v24  ;;  %v821_v37 = vadd.s32 536870912, %v820_v27 }
  0xc1   :  { %v2402_v52 = vsel %vm446_vm7, %v447_v29, %v1709_v8  ;;  %v2407_v58 = vsel %vm556_vm4, %v640_v17, %v2230_v44  ;;  %v870_v35 = vand.u32 8388607, %v3174_v31  ;;  %v878_v21 = vsub.s32 32, %v877_v26 }
  0xc2   :  { %vm2396_vm12 = vcmp.le.f32.partialorder %v3195_v16, 0.7853982  ;;  %v2413_v53 = vsel %vm443_vm6, %v1707_v0, %v444_v7  ;;  %v547_v2 = vxor.u32 2147483648, %v1713_v62  ;;  %v732_v28 = vor.u32 %v731_v45, %v730_v18 }
  0xc3   :  { %v2415_v54 = vshrl.u32 %v821_v37, 30  ;;  %v2417_v38 = vsel %vm549_vm11, %v550_v32, %v1713_v62  ;;  %v639_v8 = vsel %vm556_vm4, %v638_v6, %v637_v40  ;;  %v736_v29 = vor.u32 4788187, %v735_v41 }
  0xc4   :  { %v880_v44 = vshll.u32 %v3176_v15, %v877_v26  ;;  %v3198_v51 = vmov 2475754826   ;;  %v3199_v0 = vmov 2131351028   ;;  %v871_v31 = vor.u32 8388608, %v870_v35 }
  0xc5   :  { %v823_v17 = vshll.u32 %v2415_v54, 30  ;;  %v881_v25 = vshrl.u32 %v3198_v51, %v878_v21  ;;  %v883_v16 = vshll.u32 %v3198_v51, %v877_v26  ;;  %v884_v7 = vshrl.u32 %v3199_v0, %v878_v21 }
  0xc6   :  { %v876_v18 = vshrl.u32 %v875_v61, 5  ;;  %v886_v45 = vshll.u32 %v3199_v0, %v877_v26  ;;  %v887_v62 = vshrl.u32 %v3184_v12, %v878_v21  ;;  %v739_v32 = vcvt.s32.f32 %v732_v28 }
  0xc7   :  { %v2428_v37 = vsub.s32 %v820_v27, %v823_v17  ;;  %v889_v40 = vshll.u32 %v3184_v12, %v877_v26  ;;  %v969_v6 = vand.u32 2139095040, %v2222_v34  ;;  %v737_v41 = vand.u32 2147483647, %v736_v29 }
  0xc8   :  { %v879_v11 = vshrl.u32 %v3176_v15, %v878_v21  ;;  %v890_v57 = vshrl.u32 %v3191_v30, %v878_v21  ;;  %v892_v56 = vshll.u32 %v3191_v30, %v877_v26  ;;  %vm442_vm13 = vcmp.lt.s32.totalorder %v2320_v50, 2 }
  0xc9   :  { %v826_v61 = vsub.s32 0, %v2428_v37  ;;  %v882_v35 = vor.u32 %v881_v25, %v880_v44  ;;  %v885_v42 = vor.u32 %v884_v7, %v883_v16  ;;  %v893_v27 = vshrl.u32 %v3193_v22, %v878_v21 }
  0xca   :  { %v548_v28 = vsel %vm546_vm10, %v1711_v43, %v547_v2  ;;  %v888_v17 = vor.u32 %v887_v62, %v886_v45  ;;  %v891_v1 = vor.u32 %v890_v57, %v889_v40  ;;  %vm895_vm14 = vcmp.lt.s32.totalorder %v876_v18, 1 }
  0xcb   :  { %vm545_vm15 = vcmp.lt.s32.totalorder %v2383_v19, 2  ;;  %v2444_v26 = vsel %vm2396_vm12, %v2020_v24, %v639_v8  ;;  %vm659_vm0 = vcmp.lt.s32.totalorder %v2118_v48, 0  ;;  %v1603_v29 = vmin.u32 %v826_v61, %v2428_v37 }
  0xcc   :  { %v911_v44 = vshll.u32 %v871_v31, 8  ;;  %v970_v25 = vshrl.u32 %v969_v6, 23  ;;  %v740_v21 = vmul.f32 %v739_v32, %v737_v41  ;;  %v894_v16 = vor.u32 %v893_v27, %v892_v56 }
  0xcd   :  { %vm896_vm1 = vcmp.lt.s32.totalorder %v876_v18, 2  ;;  %vm897_vm2 = vcmp.lt.s32.totalorder %v876_v18, 3  ;;  %v828_v43 = vclz %v1603_v29  ;;  %vm898_vm3 = vcmp.lt.s32.totalorder %v876_v18, 4 }
  0xce   :  { %v899_v57 = vsel %vm895_vm14, %v879_v11, %v882_v35  ;;  %v903_v2 = vsel %vm895_vm14, %v882_v35, %v885_v42  ;;  %v900_v7 = vsel %vm898_vm3, %v888_v17, 2102212464  ;;  %v904_v45 = vsel %vm898_vm3, %v891_v1, 920167782 }
  0xcf   :  { %v907_v8 = vsel %vm895_vm14, %v885_v42, %v888_v17  ;;  %v908_v62 = vsel %vm898_vm3, %v894_v16, 1326507024  ;;  %vm440_vm4 = vweird.f32 %v2011_v59  ;;  %v1604_v40 = vadd.s32 4294967294, %v828_v43 }
  0xd0   :  { %v901_v31 = vsel %vm897_vm2, %v885_v42, %v900_v7  ;;  %v905_v6 = vsel %vm897_vm2, %v888_v17, %v904_v45  ;;  %v909_v32 = vsel %vm897_vm2, %v891_v1, %v908_v62  ;;  %1714 = vcosq.f32 %v2444_v26 }
  0xd1   :  { %v906_v56 = vsel %vm896_vm1, %v903_v2, %v905_v6  ;;  %v910_v41 = vsel %vm896_vm1, %v907_v8, %v909_v32  ;;  %v1610_v11 = vadd.s32 4294967169, %v970_v25  ;;  %v741_v61 = vxor.u32 2147483648, %v740_v21 }
  0xd2   :  { %vm1605_vm5 = vcmp.lt.s32.totalorder %v1604_v40, 0  ;;  %v2455_v35 = vmul.u32.u64.low %v911_v44, %v910_v41  ;;  %v2456_v27 = vmul.u32.u64.high %v911_v44, %v910_v41, %v2455_v35  ;;  %v902_v16 = vsel %vm896_vm1, %v899_v57, %v901_v31 }
  0xd3   :  { %v831_v29 = vsel %vm1605_vm5, 0, %v1604_v40  ;;  %v2459_v15 = vmul.u32.u64.low %v911_v44, %v906_v56  ;;  %v2460_v43 = vmul.u32.u64.high %v911_v44, %v906_v56, %v2459_v15  ;;  %v816_v1 = vadd.s32 %v2369_v20, %v2377_v46 }
  0xd4   :  { %v832_v42 = vsub.s32 32, %v831_v29  ;;  %v836_v17 = vsub.s32 4294967266, %v831_v29  ;;  %v976_v2 = vadd.s32 1, %v1610_v11  ;;  %v449_v25 = vsel %vm442_vm13, %v2413_v53, %v2402_v52 }
  0xd5   :  { %vm543_vm6 = vweird.f32 %v2014_v60  ;;  %v643_v18 = vsel %vm2396_vm12, 0, %v2407_v58  ;;  %v3200_v57 = vand.u32 2147483647, %v2118_v48  ;;  %v743_v20 = vsub.s32 4, %v2329_v63 }
  0xd6   :  { %v837_v46 = vadd.s32 127, %v836_v17  ;;  %v918_v45 = vmul.u32 %v911_v44, %v902_v16  ;;  %vm920_vm8 = vc.u32 %v2456_v27, %v2459_v15  ;;  %v552_v50 = vsel %vm545_vm15, %v548_v28, %v2417_v38 }
  0xd7   :  { %vm2475_vm7 = vcmp.le.f32.partialorder %v3200_v57, 0.7853982  ;;  %v742_v9 = vsel %vm659_vm0, %v741_v61, %v740_v21  ;;  %v921_v52 = vadd.s32 1, %v2460_v43  ;;  %vm977_vm9 = vcmp.gt.s32.totalorder %v976_v2, 0 }
  0xd8   :  { %v833_v58 = vshll.u32 %v2428_v37, %v831_v29  ;;  %v834_v53 = vshrl.u32 %v816_v1, %v832_v42  ;;  %v966_v8 = vand.u32 2147483647, %v2222_v34  ;;  %v978_v62 = vsel %vm977_vm9, %v976_v2, 0 }
  0xd9   :  { %1716 = vpow2.f32 %v2197_v49  ;;  %v838_v44 = vshll.u32 %v837_v46, 23  ;;  %v922_v40 = vsel %vm920_vm8, %v921_v52, %v2460_v43  ;;  %v980_v31 = vand.u32 31, %v978_v62 }
  0xda   :  { %1718 = vpow2.f32 %v2200_v23  ;;  %v2496_v19 = vsel %vm659_vm0, %v743_v20, %v2329_v63  ;;  %v745_v38 = vsel %vm2475_vm7, %v2118_v48, %v742_v9  ;;  %v923_v37 = vadd.s32 %v922_v40, %v918_v45 }
  0xdb   :  { %v2503_v28 = vsel %vm440_vm4, nan, %v449_v25  ;;  %v2507_v49 = vsel %vm543_vm6, nan, %v552_v50  ;;  %v2509_v21 = vand.u32 3, %v643_v18  ;;  %v981_v23 = vsub.s32 32, %v980_v31 }
  0xdc   :  { %1720 = vsinq.f32 %v2444_v26  ;;  %v835_v63 = vor.u32 %v834_v53, %v833_v58  ;;  %v924_v6 = vadd.s32 536870912, %v923_v37  ;;  %v973_v32 = vand.u32 8388607, %v966_v8 }
  0xdd   :  { %v746_v59 = vsel %vm2475_vm7, 0, %v2496_v19  ;;  %1722 = vcosq.f32 %v745_v38  ;;  %v839_v56 = vor.u32 4788187, %v838_v44  ;;  %v3203_v41 = vmov 683565275   ;;  %v2518_v11 = vpop.eup %1714 }
  0xde   :  { %v983_v60 = vshll.u32 %v3203_v41, %v980_v31  ;;  %v2520_v61 = vshrl.u32 %v924_v6, 30  ;;  %v984_v35 = vshrl.u32 %v3198_v51, %v981_v23  ;;  %v986_v26 = vshll.u32 %v3198_v51, %v980_v31 }
  0xdf   :  { %v987_v29 = vshrl.u32 %v3199_v0, %v981_v23  ;;  %v979_v16 = vshrl.u32 %v978_v62, 5  ;;  %v989_v43 = vshll.u32 %v3199_v0, %v980_v31  ;;  %v990_v1 = vshrl.u32 %v3184_v12, %v981_v23 }
  0xe0   :  { %v992_v42 = vshll.u32 %v3184_v12, %v980_v31  ;;  %v842_v17 = vcvt.s32.f32 %v835_v63  ;;  %v926_v2 = vshll.u32 %v2520_v61, 30  ;;  %v974_v25 = vor.u32 8388608, %v973_v32 }
  0xe1   :  { %v1072_v18 = vand.u32 2139095040, %v2256_v36  ;;  %vm652_vm10 = vcmp.eq.s32.totalorder %v2509_v21, 2  ;;  %v840_v57 = vand.u32 2147483647, %v839_v56  ;;  %v993_v7 = vshrl.u32 %v3191_v30, %v981_v23 }
  0xe2   :  { %v995_v20 = vshll.u32 %v3191_v30, %v980_v31  ;;  %v996_v46 = vshrl.u32 %v3193_v22, %v981_v23  ;;  %v2534_v45 = vsub.s32 %v923_v37, %v926_v2  ;;  %v982_v50 = vshrl.u32 %v3203_v41, %v981_v23 }
  0xe3   :  { %v985_v9 = vor.u32 %v984_v35, %v983_v60  ;;  %v988_v52 = vor.u32 %v987_v29, %v986_v26  ;;  %v991_v58 = vor.u32 %v990_v1, %v989_v43  ;;  %v994_v53 = vor.u32 %v993_v7, %v992_v42 }
  0xe4   :  { %v997_v62 = vor.u32 %v996_v46, %v995_v20  ;;  %vm998_vm11 = vcmp.lt.s32.totalorder %v979_v16, 1  ;;  %v653_v44 = vxor.u32 2147483648, %v2518_v11  ;;  %1724 = vsinq.f32 %v745_v38 }
  0xe5   :  { %vm762_vm12 = vcmp.lt.s32.totalorder %v2211_v33, 0  ;;  %v929_v40 = vsub.s32 0, %v2534_v45  ;;  %v2540_v31 = vshll.u32 %v974_v25, 8  ;;  %vm649_vm13 = vcmp.eq.s32.totalorder %v2509_v21, 0 }
  0xe6   :  { %v843_v19 = vmul.f32 %v842_v17, %v840_v57  ;;  %vm1000_vm14 = vcmp.lt.s32.totalorder %v979_v16, 3  ;;  %vm1001_vm15 = vcmp.lt.s32.totalorder %v979_v16, 4  ;;  %v1073_v37 = vshrl.u32 %v1072_v18, 23  ;;  %v2543_v23 = vpop.eup %1716 }
  0xe7   :  { %v1607_v63 = vmin.u32 %v929_v40, %v2534_v45  ;;  %vm999_vm0 = vcmp.lt.s32.totalorder %v979_v16, 2  ;;  %v1002_v6 = vsel %vm998_vm11, %v982_v50, %v985_v9  ;;  %v1006_v38 = vsel %vm998_vm11, %v985_v9, %v988_v52  ;;  %v2548_v32 = vpop.eup %1718 }
  0xe8   :  { %v3204_v56 = vand.u32 2147483647, %v2211_v33  ;;  %v1003_v35 = vsel %vm1001_vm15, %v991_v58, 2102212464  ;;  %v1007_v26 = vsel %vm1001_vm15, %v994_v53, 920167782  ;;  %v1010_v29 = vsel %vm998_vm11, %v988_v52, %v991_v58 }
  0xe9   :  { %v1011_v43 = vsel %vm1001_vm15, %v997_v62, 1326507024  ;;  %vm648_vm2 = vcmp.lt.s32.totalorder %v2509_v21, 2  ;;  %v931_v1 = vclz %v1607_v63  ;;  %v1004_v42 = vsel %vm1000_vm14, %v988_v52, %v1003_v35  ;;  %v1721_v25 = vpop.eup %1720 }
  0xea   :  { %vm2552_vm1 = vcmp.le.f32.partialorder %v3204_v56, 0.7853982  ;;  %v1008_v17 = vsel %vm1000_vm14, %v991_v58, %v1007_v26  ;;  %v1012_v2 = vsel %vm1000_vm14, %v994_v53, %v1011_v43  ;;  %v2561_v18 = vand.u32 3, %v746_v59  ;;  %v2565_v46 = vpop.eup %1722 }
  0xeb   :  { %v1009_v57 = vsel %vm999_vm0, %v1006_v38, %v1008_v17  ;;  %v1013_v7 = vsel %vm999_vm0, %v1010_v29, %v1012_v2  ;;  %v1614_v20 = vadd.s32 4294967169, %v1073_v37  ;;  %v844_v50 = vxor.u32 2147483648, %v843_v19 }
  0xec   :  { %v1608_v9 = vadd.s32 4294967294, %v931_v1  ;;  %v2568_v62 = vmul.u32.u64.low %v2540_v31, %v1013_v7  ;;  %v2569_v40 = vmul.u32.u64.high %v2540_v31, %v1013_v7, %v2568_v62  ;;  %v1005_v52 = vsel %vm999_vm0, %v1002_v6, %v1004_v42 }
  0xed   :  { %v2573_v58 = vmul.u32.u64.low %v2540_v31, %v1009_v57  ;;  %v2574_v53 = vmul.u32.u64.high %v2540_v31, %v1009_v57, %v2573_v58  ;;  %v1079_v59 = vadd.s32 1, %v1614_v20  ;;  %v650_v63 = vxor.u32 2147483648, %v1721_v25 }
  0xee   :  { %v654_v37 = vsel %vm652_vm10, %v653_v44, %v1721_v25  ;;  %v919_v38 = vadd.s32 %v2459_v15, %v2456_v27  ;;  %vm1609_vm3 = vcmp.lt.s32.totalorder %v1608_v9, 0  ;;  %v846_v56 = vsub.s32 4, %v2415_v54 }
  0xef   :  { %v934_v35 = vsel %vm1609_vm3, 0, %v1608_v9  ;;  %v1069_v16 = vand.u32 2147483647, %v2256_v36  ;;  %vm1080_vm4 = vcmp.gt.s32.totalorder %v1079_v59, 0  ;;  %v1021_v43 = vmul.u32 %v2540_v31, %v1005_v52 }
  0xf0   :  { %v935_v6 = vsub.s32 32, %v934_v35  ;;  %v936_v26 = vshll.u32 %v2534_v45, %v934_v35  ;;  %v939_v29 = vsub.s32 4294967266, %v934_v35  ;;  %v845_v1 = vsel %vm762_vm12, %v844_v50, %v843_v19 }
  0xf1   :  { %vm1023_vm5 = vc.u32 %v2569_v40, %v2573_v58  ;;  %v1024_v15 = vadd.s32 1, %v2574_v53  ;;  %v1081_v27 = vsel %vm1080_vm4, %v1079_v59, 0  ;;  %v651_v44 = vsel %vm649_vm13, %v2518_v11, %v650_v63  ;;  %v1725_v45 = vpop.eup %1724 }
  0xf2   :  { %v937_v42 = vshrl.u32 %v919_v38, %v935_v6  ;;  %v940_v17 = vadd.s32 127, %v939_v29  ;;  %v1083_v2 = vand.u32 31, %v1081_v27  ;;  %vm752_vm6 = vcmp.eq.s32.totalorder %v2561_v18, 0 }
  0xf3   :  { %vm755_vm7 = vcmp.eq.s32.totalorder %v2561_v18, 2  ;;  %v756_v31 = vxor.u32 2147483648, %v2565_v46  ;;  %vm865_vm8 = vcmp.lt.s32.totalorder %v2218_v3, 0  ;;  %v1025_v19 = vsel %vm1023_vm5, %v1024_v15, %v2574_v53 }
  0xf4   :  { %v848_v25 = vsel %vm2552_vm1, %v2211_v33, %v845_v1  ;;  %v938_v57 = vor.u32 %v937_v42, %v936_v26  ;;  %v941_v11 = vshll.u32 %v940_v17, 23  ;;  %v1026_v7 = vadd.s32 %v1025_v19, %v1021_v43 }
  0xf5   :  { %v2603_v20 = vsel %vm648_vm2, %v651_v44, %v654_v37  ;;  %v2608_v50 = vsel %vm762_vm12, %v846_v56, %v2415_v54  ;;  %v1076_v9 = vand.u32 8388607, %v1069_v16  ;;  %v1084_v62 = vsub.s32 32, %v1083_v2 }
  0xf6   :  { %v753_v52 = vxor.u32 2147483648, %v1725_v45  ;;  %v3207_v53 = vand.u32 2147483647, %v2218_v3  ;;  %v942_v63 = vor.u32 4788187, %v941_v11  ;;  %v945_v21 = vcvt.s32.f32 %v938_v57 }
  0xf7   :  { %v1027_v37 = vadd.s32 536870912, %v1026_v7  ;;  %v2620_v38 = vsel %vm755_vm7, %v756_v31, %v1725_v45  ;;  %1726 = vcosq.f32 %v848_v25  ;;  %v1086_v54 = vshll.u32 %v3203_v41, %v1083_v2 }
  0xf8   :  { %vm2614_vm9 = vcmp.le.f32.partialorder %v3207_v53, 0.7853982  ;;  %v1089_v56 = vshll.u32 %v3198_v51, %v1083_v2  ;;  %v943_v35 = vand.u32 2147483647, %v942_v63  ;;  %v1087_v26 = vshrl.u32 %v3198_v51, %v1084_v62 }
  0xf9   :  { %v2624_v6 = vshrl.u32 %v1027_v37, 30  ;;  %v1090_v29 = vshrl.u32 %v3199_v0, %v1084_v62  ;;  %v1077_v43 = vor.u32 8388608, %v1076_v9  ;;  %v1082_v1 = vshrl.u32 %v1081_v27, 5 }
  0xfa   :  { %v1092_v15 = vshll.u32 %v3199_v0, %v1083_v2  ;;  %v1175_v44 = vand.u32 2139095040, %v2280_v39  ;;  %v946_v42 = vmul.f32 %v945_v21, %v943_v35  ;;  %v1093_v45 = vshrl.u32 %v3184_v12, %v1084_v62 }
  0xfb   :  { %v1029_v17 = vshll.u32 %v2624_v6, 30  ;;  %v1095_v31 = vshll.u32 %v3184_v12, %v1083_v2  ;;  %v1085_v19 = vshrl.u32 %v3203_v41, %v1084_v62  ;;  %v1096_v57 = vshrl.u32 %v3191_v30, %v1084_v62 }
  0xfc   :  { %v1098_v11 = vshll.u32 %v3191_v30, %v1083_v2  ;;  %v1099_v9 = vshrl.u32 %v3193_v22, %v1084_v62  ;;  %v947_v27 = vxor.u32 2147483648, %v946_v42  ;;  %v1088_v63 = vor.u32 %v1087_v26, %v1086_v54 }
  0xfd   :  { %v2637_v53 = vsub.s32 %v1026_v7, %v1029_v17  ;;  %v1091_v37 = vor.u32 %v1090_v29, %v1089_v56  ;;  %v754_v21 = vsel %vm752_vm6, %v2565_v46, %v753_v52  ;;  %1728 = vsinq.f32 %v848_v25 }
  0xfe   :  { %v1097_v35 = vor.u32 %v1096_v57, %v1095_v31  ;;  %vm1101_vm10 = vcmp.lt.s32.totalorder %v1082_v1, 1  ;;  %vm646_vm11 = vweird.f32 %v2020_v24  ;;  %vm751_vm12 = vcmp.lt.s32.totalorder %v2561_v18, 2 }
  0xff   :  { %v948_v2 = vsel %vm865_vm8, %v947_v27, %v946_v42  ;;  %v1032_v62 = vsub.s32 0, %v2637_v53  ;;  %v1094_v7 = vor.u32 %v1093_v45, %v1092_v15  ;;  %v1117_v17 = vshll.u32 %v1077_v43, 8 }
 0x100   :  { %v1100_v54 = vor.u32 %v1099_v9, %v1098_v11  ;;  %vm1103_vm13 = vcmp.lt.s32.totalorder %v1082_v1, 3  ;;  %vm1104_vm14 = vcmp.lt.s32.totalorder %v1082_v1, 4  ;;  %v1176_v56 = vshrl.u32 %v1175_v44, 23 }
 0x101   :  { %v1611_v46 = vmin.u32 %v1032_v62, %v2637_v53  ;;  %vm1102_vm15 = vcmp.lt.s32.totalorder %v1082_v1, 2  ;;  %v1105_v25 = vsel %vm1101_vm10, %v1085_v19, %v1088_v63  ;;  %v1109_v52 = vsel %vm1101_vm10, %v1088_v63, %v1091_v37 }
 0x102   :  { %v949_v26 = vsub.s32 4, %v2520_v61  ;;  %v951_v29 = vsel %vm2614_vm9, %v2218_v3, %v948_v2  ;;  %v1106_v15 = vsel %vm1104_vm14, %v1094_v7, 2102212464  ;;  %v1110_v43 = vsel %vm1104_vm14, %v1097_v35, 920167782 }
 0x103   :  { %vm749_vm0 = vweird.f32 %v2118_v48  ;;  %v1034_v44 = vclz %v1611_v46  ;;  %v1107_v42 = vsel %vm1103_vm13, %v1091_v37, %v1106_v15  ;;  %v1111_v45 = vsel %vm1103_vm13, %v1094_v7, %v1110_v43 }
 0x104   :  { %v1113_v31 = vsel %vm1101_vm10, %v1091_v37, %v1094_v7  ;;  %v1108_v19 = vsel %vm1102_vm15, %v1105_v25, %v1107_v42  ;;  %v1112_v57 = vsel %vm1102_vm15, %v1109_v52, %v1111_v45  ;;  %v1114_v11 = vsel %vm1104_vm14, %v1100_v54, 1326507024  ;;  %v2663_v27 = vpop.eup %1726 }
 0x105   :  { %v1618_v9 = vadd.s32 4294967169, %v1176_v56  ;;  %v1612_v63 = vadd.s32 4294967294, %v1034_v44  ;;  %v1115_v2 = vsel %vm1103_vm13, %v1097_v35, %v1114_v11  ;;  %v950_v37 = vsel %vm865_vm8, %v949_v26, %v2520_v61 }
 0x106   :  { %v2666_v62 = vmul.u32.u64.low %v1117_v17, %v1112_v57  ;;  %v2667_v46 = vmul.u32.u64.high %v1117_v17, %v1112_v57, %v2666_v62  ;;  %v1116_v7 = vsel %vm1102_vm15, %v1113_v31, %v1115_v2  ;;  %v3178_v25 = vand.u32 2147483647, %v2280_v39 }
 0x107   :  { %v1182_v52 = vadd.s32 1, %v1618_v9  ;;  %vm968_vm2 = vcmp.lt.s32.totalorder %v2222_v34, 0  ;;  %v1022_v54 = vadd.s32 %v2573_v58, %v2569_v40  ;;  %vm1613_vm3 = vcmp.lt.s32.totalorder %v1612_v63, 0 }
 0x108   :  { %v2678_v35 = vmul.u32.u64.low %v1117_v17, %v1116_v7  ;;  %v2679_v56 = vmul.u32.u64.high %v1117_v17, %v1116_v7, %v2678_v35  ;;  %1730 = vcosq.f32 %v951_v29  ;;  %v1037_v15 = vsel %vm1613_vm3, 0, %v1612_v63 }
 0x109   :  { %v1124_v43 = vmul.u32 %v1117_v17, %v1108_v19  ;;  %vm1183_vm4 = vcmp.gt.s32.totalorder %v1182_v52, 0  ;;  %v1038_v44 = vsub.s32 32, %v1037_v15  ;;  %v1039_v61 = vshll.u32 %v2637_v53, %v1037_v15 }
 0x10a   :  { %v1042_v1 = vsub.s32 4294967266, %v1037_v15  ;;  %v1127_v26 = vadd.s32 1, %v2667_v46  ;;  %v2686_v42 = vsel %vm646_vm11, nan, %v2603_v20  ;;  %v758_v40 = vsel %vm751_vm12, %v754_v21, %v2620_v38  ;;  %v2694_v45 = vpop.eup %1728 }
 0x10b   :  { %v849_v58 = vsel %vm2552_vm1, 0, %v2608_v50  ;;  %v1184_v17 = vsel %vm1183_vm4, %v1182_v52, 0  ;;  %v952_v53 = vsel %vm2614_vm9, 0, %v950_v37  ;;  %vm2700_vm5 = vcmp.le.f32.partialorder %v966_v8, 0.7853982 }
 0x10c   :  { %v1040_v20 = vshrl.u32 %v1022_v54, %v1038_v44  ;;  %v1043_v31 = vadd.s32 127, %v1042_v1  ;;  %vm1126_vm6 = vc.u32 %v2679_v56, %v2666_v62  ;;  %v1052_v60 = vsub.s32 4, %v2624_v6 }
 0x10d   :  { %v1128_v18 = vsel %vm1126_vm6, %v1127_v26, %v2667_v46  ;;  %v1179_v50 = vand.u32 8388607, %v3178_v25  ;;  %v1186_v59 = vand.u32 31, %v1184_v17  ;;  %v2710_v38 = vand.u32 3, %v849_v58 }
 0x10e   :  { %v1041_v21 = vor.u32 %v1040_v20, %v1039_v61  ;;  %v1044_v8 = vshll.u32 %v1043_v31, 23  ;;  %v1129_v19 = vadd.s32 %v1128_v18, %v1124_v43  ;;  %v2714_v57 = vsel %vm749_vm0, nan, %v758_v40 }
 0x10f   :  { %v859_v11 = vxor.u32 2147483648, %v2663_v27  ;;  %v2717_v9 = vand.u32 3, %v952_v53  ;;  %v1187_v63 = vsub.s32 32, %v1186_v59  ;;  %1732 = vsinq.f32 %v951_v29 }
 0x110   :  { %v1045_v46 = vor.u32 4788187, %v1044_v8  ;;  %v1048_v37 = vcvt.s32.f32 %v1041_v21  ;;  %v1130_v7 = vadd.s32 536870912, %v1129_v19  ;;  %v2723_v52 = vsel %vm968_vm2, %v1052_v60, %v2624_v6 }
 0x111   :  { %v1180_v54 = vor.u32 8388608, %v1179_v50  ;;  %v1275_v48 = vand.u32 2147483647, %v2314_v47  ;;  %v1185_v43 = vshrl.u32 %v1184_v17, 5  ;;  %v1189_v44 = vshll.u32 %v3203_v41, %v1186_v59 }
 0x112   :  { %v1046_v35 = vand.u32 2147483647, %v1045_v46  ;;  %v2726_v15 = vshrl.u32 %v1130_v7, 30  ;;  %v1190_v61 = vshrl.u32 %v3198_v51, %v1187_v63  ;;  %v1192_v1 = vshll.u32 %v3198_v51, %v1186_v59 }
 0x113   :  { %v1193_v29 = vshrl.u32 %v3199_v0, %v1187_v63  ;;  %v1195_v26 = vshll.u32 %v3199_v0, %v1186_v59  ;;  %v1196_v58 = vshrl.u32 %v3184_v12, %v1187_v63  ;;  %v1198_v53 = vshll.u32 %v3184_v12, %v1186_v59 }
 0x114   :  { %v1049_v40 = vmul.f32 %v1048_v37, %v1046_v35  ;;  %v1132_v6 = vshll.u32 %v2726_v15, 30  ;;  %v1199_v20 = vshrl.u32 %v3191_v30, %v1187_v63  ;;  %v1201_v31 = vshll.u32 %v3191_v30, %v1186_v59 }
 0x115   :  { %v1278_v60 = vand.u32 2139095040, %v2314_v47  ;;  %v2742_v18 = vpop.eup %1730  ;;  %v1202_v8 = vshrl.u32 %v3193_v22, %v1187_v63  ;;  %v2747_v46 = vshll.u32 %v1180_v54, 8  ;;  %v1188_v37 = vshrl.u32 %v3203_v41, %v1187_v63 }
 0x116   :  { %v1050_v50 = vxor.u32 2147483648, %v1049_v40  ;;  %v2744_v21 = vsub.s32 %v1129_v19, %v1132_v6  ;;  %v1191_v7 = vor.u32 %v1190_v61, %v1189_v44  ;;  %v1194_v35 = vor.u32 %v1193_v29, %v1192_v1 }
 0x117   :  { %v2752_v25 = vand.u32 8388607, %v1275_v48  ;;  %v1197_v17 = vor.u32 %v1196_v58, %v1195_v26  ;;  %v1200_v2 = vor.u32 %v1199_v20, %v1198_v53  ;;  %vm1204_vm1 = vcmp.lt.s32.totalorder %v1185_v43, 1 }
 0x118   :  { %v1135_v59 = vsub.s32 0, %v2744_v21  ;;  %vm858_vm7 = vcmp.eq.s32.totalorder %v2710_v38, 2  ;;  %v1125_v19 = vadd.s32 %v2666_v62, %v2679_v56  ;;  %v1203_v54 = vor.u32 %v1202_v8, %v1201_v31 }
 0x119   :  { %vm1207_vm8 = vcmp.lt.s32.totalorder %v1185_v43, 4  ;;  %v1279_v6 = vshrl.u32 %v1278_v60, 23  ;;  %vm855_vm9 = vcmp.eq.s32.totalorder %v2710_v38, 0  ;;  %v962_v63 = vxor.u32 2147483648, %v2742_v18 }
 0x11a   :  { %v1051_v44 = vsel %vm968_vm2, %v1050_v50, %v1049_v40  ;;  %v1615_v61 = vmin.u32 %v1135_v59, %v2744_v21  ;;  %vm1206_vm10 = vcmp.lt.s32.totalorder %v1185_v43, 3  ;;  %vm1205_vm11 = vcmp.lt.s32.totalorder %v1185_v43, 2 }
 0x11b   :  { %v1208_v1 = vsel %vm1204_vm1, %v1188_v37, %v1191_v7  ;;  %v1209_v29 = vsel %vm1207_vm8, %v1197_v17, 2102212464  ;;  %v1212_v62 = vsel %vm1204_vm1, %v1191_v7, %v1194_v35  ;;  %vm958_vm12 = vcmp.eq.s32.totalorder %v2717_v9, 0 }
 0x11c   :  { %vm961_vm13 = vcmp.eq.s32.totalorder %v2717_v9, 2  ;;  %v1137_v56 = vclz %v1615_v61  ;;  %v1210_v26 = vsel %vm1206_vm10, %v1194_v35, %v1209_v29  ;;  %v1213_v58 = vsel %vm1207_vm8, %v1200_v2, 920167782  ;;  %v1733_v50 = vpop.eup %1732 }
 0x11d   :  { %v1216_v40 = vsel %vm1204_vm1, %v1194_v35, %v1197_v17  ;;  %v1054_v53 = vsel %vm2700_vm5, %v2222_v34, %v1051_v44  ;;  %v1214_v20 = vsel %vm1206_vm10, %v1197_v17, %v1213_v58  ;;  %v1217_v31 = vsel %vm1207_vm8, %v1203_v54, 1326507024 }
 0x11e   :  { %v1622_v60 = vadd.s32 4294967169, %v1279_v6  ;;  %vm1071_vm14 = vcmp.lt.s32.totalorder %v2256_v36, 0  ;;  %v1616_v8 = vadd.s32 4294967294, %v1137_v56  ;;  %v1211_v37 = vsel %vm1205_vm11, %v1208_v1, %v1210_v26 }
 0x11f   :  { %v1215_v7 = vsel %vm1205_vm11, %v1212_v62, %v1214_v20  ;;  %v1218_v59 = vsel %vm1206_vm10, %v1200_v2, %v1217_v31  ;;  %vm854_vm15 = vcmp.lt.s32.totalorder %v2710_v38, 2  ;;  %1734 = vcosq.f32 %v1054_v53 }
 0x120   :  { %v1219_v35 = vsel %vm1205_vm11, %v1216_v40, %v1218_v59  ;;  %v2782_v61 = vmul.u32.u64.low %v2747_v46, %v1215_v7  ;;  %v2783_v44 = vmul.u32.u64.high %v2747_v46, %v1215_v7, %v2782_v61  ;;  %v1285_v17 = vadd.s32 1, %v1622_v60 }
 0x121   :  { %vm1617_vm0 = vcmp.lt.s32.totalorder %v1616_v8, 0  ;;  %v2788_v54 = vmul.u32.u64.low %v2747_v46, %v1219_v35  ;;  %v2789_v6 = vmul.u32.u64.high %v2747_v46, %v1219_v35, %v2788_v54  ;;  %vm957_vm2 = vcmp.lt.s32.totalorder %v2717_v9, 2 }
 0x122   :  { %1736 = vsinq.f32 %v1054_v53  ;;  %v1140_v2 = vsel %vm1617_vm0, 0, %v1616_v8  ;;  %v1227_v43 = vmul.u32 %v2747_v46, %v1211_v37  ;;  %vm1286_vm3 = vcmp.gt.s32.totalorder %v1285_v17, 0 }
 0x123   :  { %v1141_v1 = vsub.s32 32, %v1140_v2  ;;  %v1142_v29 = vshll.u32 %v2744_v21, %v1140_v2  ;;  %v1145_v62 = vsub.s32 4294967266, %v1140_v2  ;;  %v1287_v56 = vsel %vm1286_vm3, %v1285_v17, 0 }
 0x124   :  { %v959_v26 = vxor.u32 2147483648, %v1733_v50  ;;  %vm2796_vm4 = vcmp.le.f32.partialorder %v1069_v16, 0.7853982  ;;  %v1155_v40 = vsub.s32 4, %v2726_v15  ;;  %v1230_v53 = vadd.s32 1, %v2783_v44 }
 0x125   :  { %v1289_v20 = vand.u32 31, %v1287_v56  ;;  %v860_v21 = vsel %vm858_vm7, %v859_v11, %v2694_v45  ;;  %v1143_v46 = vshrl.u32 %v1125_v19, %v1141_v1  ;;  %v1146_v31 = vadd.s32 127, %v1145_v62 }
 0x126   :  { %vm1229_vm6 = vc.u32 %v2789_v6, %v2782_v61  ;;  %v3214_v16 = vxor.u32 2147483648, %v2694_v45  ;;  %v3215_v8 = vsel %vm2700_vm5, 0, %v2723_v52  ;;  %v1283_v17 = vor.u32 8388608, %v2752_v25 }
 0x127   :  { %v2818_v37 = vand.u32 3, %v3215_v8  ;;  %v1231_v7 = vsel %vm1229_vm6, %v1230_v53, %v2783_v44  ;;  %v1290_v11 = vsub.s32 32, %v1289_v20  ;;  %v1144_v19 = vor.u32 %v1143_v46, %v1142_v29 }
 0x128   :  { %v857_v60 = vsel %vm855_vm9, %v2663_v27, %v3214_v16  ;;  %v1147_v59 = vshll.u32 %v1146_v31, 23  ;;  %v1232_v35 = vadd.s32 %v1231_v7, %v1227_v43  ;;  %v960_v45 = vsel %vm958_vm12, %v2742_v18, %v959_v26 }
 0x129   :  { %v963_v27 = vsel %vm961_vm13, %v962_v63, %v1733_v50  ;;  %v2830_v24 = vsel %vm1071_vm14, %v1155_v40, %v2726_v15  ;;  %v2832_v52 = vshrl.u32 %v1287_v56, 5  ;;  %v1151_v54 = vcvt.s32.f32 %v1144_v19 }
 0x12a   :  { %v1148_v44 = vor.u32 4788187, %v1147_v59  ;;  %v1233_v2 = vadd.s32 536870912, %v1232_v35  ;;  %v1292_v43 = vshll.u32 %v3203_v41, %v1289_v20  ;;  %v1293_v25 = vshrl.u32 %v3198_v51, %v1290_v11 }
 0x12b   :  { %v1295_v1 = vshll.u32 %v3198_v51, %v1289_v20  ;;  %v1296_v18 = vshrl.u32 %v3199_v0, %v1290_v11  ;;  %v1298_v63 = vshll.u32 %v3199_v0, %v1289_v20  ;;  %v1299_v15 = vshrl.u32 %v3184_v12, %v1290_v11 }
 0x12c   :  { %v1149_v50 = vand.u32 2147483647, %v1148_v44  ;;  %v2839_v29 = vshrl.u32 %v1233_v2, 30  ;;  %v1301_v62 = vshll.u32 %v3184_v12, %v1289_v20  ;;  %v2845_v56 = vsel %vm854_vm15, %v857_v60, %v860_v21  ;;  %v1735_v21 = vpop.eup %1734 }
 0x12d   :  { %v1302_v26 = vshrl.u32 %v3191_v30, %v1290_v11  ;;  %v1304_v40 = vshll.u32 %v3191_v30, %v1289_v20  ;;  %v1305_v53 = vshrl.u32 %v3193_v22, %v1290_v11  ;;  %v2852_v46 = vsel %vm957_vm2, %v960_v45, %v963_v27 }
 0x12e   :  { %vm1064_vm5 = vcmp.eq.s32.totalorder %v2818_v37, 2  ;;  %v1152_v31 = vmul.f32 %v1151_v54, %v1149_v50  ;;  %v1158_v16 = vsel %vm2796_vm4, 0, %v2830_v24  ;;  %v1235_v38 = vshll.u32 %v2839_v29, 30 }
 0x12f   :  { %vm1061_vm1 = vcmp.eq.s32.totalorder %v2818_v37, 0  ;;  %v1294_v60 = vor.u32 %v1293_v25, %v1292_v43  ;;  %v1297_v20 = vor.u32 %v1296_v18, %v1295_v1  ;;  %v1303_v8 = vor.u32 %v1302_v26, %v1301_v62  ;;  %v1737_v9 = vpop.eup %1736 }
 0x130   :  { %v2860_v7 = vshll.u32 %v1283_v17, 8  ;;  %v1153_v19 = vxor.u32 2147483648, %v1152_v31  ;;  %v2862_v59 = vsub.s32 %v1232_v35, %v1235_v38  ;;  %v1300_v45 = vor.u32 %v1299_v15, %v1298_v63 }
 0x131   :  { %vm1307_vm7 = vcmp.lt.s32.totalorder %v2832_v52, 1  ;;  %vm1174_vm8 = vcmp.lt.s32.totalorder %v2280_v39, 0  ;;  %v1291_v27 = vshrl.u32 %v3203_v41, %v1290_v11  ;;  %v1306_v44 = vor.u32 %v1305_v53, %v1304_v40 }
 0x132   :  { %vm1310_vm9 = vcmp.lt.s32.totalorder %v2832_v52, 4  ;;  %v1378_v54 = vand.u32 2147483647, %v2318_v13  ;;  %vm852_vm10 = vweird.f32 %v2211_v33  ;;  %v1154_v17 = vsel %vm1071_vm14, %v1153_v19, %v1152_v31 }
 0x133   :  { %v1238_v35 = vsub.s32 0, %v2862_v59  ;;  %vm1309_vm11 = vcmp.lt.s32.totalorder %v2832_v52, 3  ;;  %v1312_v2 = vsel %vm1310_vm9, %v1300_v45, 2102212464  ;;  %v1157_v11 = vsel %vm2796_vm4, %v2256_v36, %v1154_v17 }
 0x134   :  { %vm1308_vm12 = vcmp.lt.s32.totalorder %v2832_v52, 2  ;;  %v1315_v43 = vsel %vm1307_vm7, %v1294_v60, %v1297_v20  ;;  %v1316_v25 = vsel %vm1310_vm9, %v1303_v8, 920167782  ;;  %vm955_vm13 = vweird.f32 %v2218_v3 }
 0x135   :  { %vm1060_vm14 = vcmp.lt.s32.totalorder %v2818_v37, 2  ;;  %v1062_v1 = vxor.u32 2147483648, %v1737_v9  ;;  %v1065_v18 = vxor.u32 2147483648, %v1735_v21  ;;  %1738 = vcosq.f32 %v1157_v11 }
 0x136   :  { %v1619_v63 = vmin.u32 %v1238_v35, %v2862_v59  ;;  %v1258_v50 = vsub.s32 4, %v2839_v29  ;;  %v1311_v15 = vsel %vm1307_vm7, %v1291_v27, %v1294_v60  ;;  %v1313_v62 = vsel %vm1309_vm11, %v1297_v20, %v1312_v2 }
 0x137   :  { %v1317_v26 = vsel %vm1309_vm11, %v1300_v45, %v1316_v25  ;;  %v3216_v40 = vand.u32 2147483647, %v2280_v39  ;;  %v1319_v19 = vsel %vm1307_vm7, %v1297_v20, %v1300_v45  ;;  %v1320_v60 = vsel %vm1310_vm9, %v1306_v44, 1326507024 }
 0x138   :  { %v1240_v31 = vclz %v1619_v63  ;;  %v1318_v38 = vsel %vm1308_vm12, %v1315_v43, %v1317_v26  ;;  %1740 = vsinq.f32 %v1157_v11  ;;  %v1321_v27 = vsel %vm1309_vm11, %v1303_v8, %v1320_v60 }
 0x139   :  { %vm2896_vm15 = vcmp.le.f32.partialorder %v3216_v40, 0.7853982  ;;  %v2909_v17 = vmul.u32.u64.low %v2860_v7, %v1318_v38  ;;  %v2910_v35 = vmul.u32.u64.high %v2860_v7, %v1318_v38, %v2909_v17  ;;  %vm1058_vm0 = vweird.f32 %v2222_v34 }
 0x13a   :  { %v1620_v2 = vadd.s32 4294967294, %v1240_v31  ;;  %v1314_v43 = vsel %vm1308_vm12, %v1311_v15, %v1313_v62  ;;  %v1322_v20 = vsel %vm1308_vm12, %v1319_v19, %v1321_v27  ;;  %v1381_v45 = vand.u32 2139095040, %v2318_v13 }
 0x13b   :  { %v1066_v44 = vsel %vm1064_vm5, %v1065_v18, %v1737_v9  ;;  %v1228_v8 = vadd.s32 %v2782_v61, %v2789_v6  ;;  %v2923_v11 = vmul.u32.u64.low %v2860_v7, %v1322_v20  ;;  %v2924_v25 = vmul.u32.u64.high %v2860_v7, %v1322_v20, %v2923_v11 }
 0x13c   :  { %v1063_v63 = vsel %vm1061_vm1, %v1735_v21, %v1062_v1  ;;  %vm1621_vm2 = vcmp.lt.s32.totalorder %v1620_v2, 0  ;;  %v1259_v52 = vsel %vm1174_vm8, %v1258_v50, %v2839_v29  ;;  %v1382_v15 = vshrl.u32 %v1381_v45, 23 }
 0x13d   :  { %v1243_v62 = vsel %vm1621_vm2, 0, %v1620_v2  ;;  %v1330_v26 = vmul.u32 %v2860_v7, %v1314_v43  ;;  %v1333_v9 = vadd.s32 1, %v2910_v35  ;;  %v1630_v61 = vadd.f32 -0.60653067, %v2503_v28 }
 0x13e   :  { %v1244_v6 = vsub.s32 32, %v1243_v62  ;;  %v1245_v18 = vshll.u32 %v2862_v59, %v1243_v62  ;;  %v1248_v40 = vsub.s32 4294967266, %v1243_v62  ;;  %v1626_v31 = vadd.s32 4294967169, %v1382_v15 }
 0x13f   :  { %v862_v21 = vsel %vm852_vm10, nan, %v2845_v56  ;;  %v2942_v29 = vand.u32 3, %v1158_v16  ;;  %vm1332_vm3 = vc.u32 %v2924_v25, %v2909_v17  ;;  %v1385_v28 = vand.u32 8388607, %v1378_v54 }
 0x140   :  { %v1246_v7 = vshrl.u32 %v1228_v8, %v1244_v6  ;;  %v1249_v1 = vadd.s32 127, %v1248_v40  ;;  %v1334_v59 = vsel %vm1332_vm3, %v1333_v9, %v2910_v35  ;;  %v1388_v50 = vadd.s32 1, %v1626_v31 }
 0x141   :  { %v2951_v33 = vsel %vm955_vm13, nan, %v2852_v46  ;;  %v1067_v58 = vsel %vm1060_vm14, %v1063_v63, %v1066_v44  ;;  %v1261_v24 = vsel %vm2896_vm15, 0, %v1259_v52  ;;  %v1335_v56 = vadd.s32 %v1334_v59, %v1330_v26 }
 0x142   :  { %v1247_v16 = vor.u32 %v1246_v7, %v1245_v18  ;;  %v1250_v38 = vshll.u32 %v1249_v1, 23  ;;  %vm1389_vm4 = vcmp.gt.s32.totalorder %v1388_v50, 0  ;;  %v2958_v19 = vmul.f32 %v2237_v5, %v1630_v61  ;;  %v1739_v60 = vpop.eup %1738 }
 0x143   :  { %vm1164_vm6 = vcmp.eq.s32.totalorder %v2942_v29, 0  ;;  %v1336_v27 = vadd.s32 536870912, %v1335_v56  ;;  %v1386_v3 = vor.u32 8388608, %v1385_v28  ;;  %v1390_v46 = vsel %vm1389_vm4, %v1388_v50, 0 }
 0x144   :  { %vm1167_vm5 = vcmp.eq.s32.totalorder %v2942_v29, 2  ;;  %v1251_v37 = vor.u32 4788187, %v1250_v38  ;;  %v1254_v35 = vcvt.s32.f32 %v1247_v16  ;;  %v1631_v2 = vadd.f32 -0.60653067, %v2507_v49 }
 0x145   :  { %v2965_v43 = vsel %vm1058_vm0, nan, %v1067_v58  ;;  %v2967_v20 = vand.u32 3, %v1261_v24  ;;  %v2969_v5 = vshrl.u32 %v1336_v27, 30  ;;  %v1392_v45 = vand.u32 31, %v1390_v46  ;;  %v1741_v44 = vpop.eup %1740 }
 0x146   :  { %v1168_v8 = vxor.u32 2147483648, %v1739_v60  ;;  %v1252_v11 = vand.u32 2147483647, %v1251_v37  ;;  %v2972_v63 = vadd.s32 %v2909_v17, %v2924_v25  ;;  %v1632_v52 = vadd.f32 -0.60653067, %v2686_v42 }
 0x147   :  { %v1338_v15 = vshll.u32 %v2969_v5, 30  ;;  %v1391_v49 = vshrl.u32 %v1390_v46, 5  ;;  %v1393_v62 = vsub.s32 32, %v1392_v45  ;;  %v2976_v34 = vshll.u32 %v1386_v3, 8 }
 0x148   :  { %vm1163_vm1 = vcmp.lt.s32.totalorder %v2942_v29, 2  ;;  %v1255_v26 = vmul.f32 %v1254_v35, %v1252_v11  ;;  %v2980_v9 = vadd.f32 -0.60653067, %v2714_v57  ;;  %v2982_v61 = vadd.f32 -0.60653067, %v862_v21 }
 0x149   :  { %v2985_v6 = vmul.f32 %v2243_v55, %v1631_v2  ;;  %v1165_v17 = vxor.u32 2147483648, %v1741_v44  ;;  %v2987_v25 = vsub.s32 %v1335_v56, %v1338_v15  ;;  %v1395_v42 = vshll.u32 %v3203_v41, %v1392_v45 }
 0x14a   :  { %v1398_v18 = vshll.u32 %v3198_v51, %v1392_v45  ;;  %v1169_v40 = vsel %vm1167_vm5, %v1168_v8, %v1741_v44  ;;  %v1256_v31 = vxor.u32 2147483648, %v1255_v26  ;;  %v1396_v28 = vshrl.u32 %v3198_v51, %v1393_v62 }
 0x14b   :  { %v1399_v57 = vshrl.u32 %v3199_v0, %v1393_v62  ;;  %v1341_v21 = vsub.s32 0, %v2987_v25  ;;  %v1401_v55 = vshll.u32 %v3199_v0, %v1392_v45  ;;  %v1402_v7 = vshrl.u32 %v3184_v12, %v1393_v62 }
 0x14c   :  { %vm1410_vm7 = vcmp.lt.s32.totalorder %v1391_v49, 1  ;;  %v1257_v1 = vsel %vm1174_vm8, %v1256_v31, %v1255_v26  ;;  %v1394_v59 = vshrl.u32 %v3203_v41, %v1393_v62  ;;  %v1404_v50 = vshll.u32 %v3184_v12, %v1392_v45 }
 0x14d   :  { %vm1411_vm9 = vcmp.lt.s32.totalorder %v1391_v49, 2  ;;  %vm1161_vm10 = vweird.f32 %v2256_v36  ;;  %v1260_v51 = vsel %vm2896_vm15, %v2280_v39, %v1257_v1  ;;  %v1623_v58 = vmin.u32 %v1341_v21, %v2987_v25 }
 0x14e   :  { %v1397_v0 = vor.u32 %v1396_v28, %v1395_v42  ;;  %v1400_v24 = vor.u32 %v1399_v57, %v1398_v18  ;;  %v1166_v56 = vsel %vm1164_vm6, %v1739_v60, %v1165_v17  ;;  %1742 = vcosq.f32 %v1260_v51 }
 0x14f   :  { %v1403_v16 = vor.u32 %v1402_v7, %v1401_v55  ;;  %v1405_v41 = vshrl.u32 %v3191_v30, %v1393_v62  ;;  %1744 = vsinq.f32 %v1260_v51  ;;  %v1343_v12 = vclz %v1623_v58 }
 0x150   :  { %v1407_v38 = vshll.u32 %v3191_v30, %v1392_v45  ;;  %v1408_v27 = vshrl.u32 %v3193_v22, %v1393_v62  ;;  %vm1412_vm8 = vcmp.lt.s32.totalorder %v1391_v49, 3  ;;  %vm1413_vm11 = vcmp.lt.s32.totalorder %v1391_v49, 4 }
 0x151   :  { %v1406_v3 = vor.u32 %v1405_v41, %v1404_v50  ;;  %v1414_v53 = vsel %vm1410_vm7, %v1394_v59, %v1397_v0  ;;  %v1624_v46 = vadd.s32 4294967294, %v1343_v12  ;;  %v1415_v35 = vsel %vm1413_vm11, %v1403_v16, 2102212464 }
 0x152   :  { %v1409_v37 = vor.u32 %v1408_v27, %v1407_v38  ;;  %v1418_v60 = vsel %vm1410_vm7, %v1397_v0, %v1400_v24  ;;  %v1416_v2 = vsel %vm1412_vm8, %v1400_v24, %v1415_v35  ;;  %v1422_v8 = vsel %vm1410_vm7, %v1400_v24, %v1403_v16  ;;  %v3220_v27 = vld [vmem:[#allocation9_spill] sm:$0xff] }
 0x153   :  { %v1419_v44 = vsel %vm1413_vm11, %v1406_v3, 920167782  ;;  %v3017_v11 = vmul.f32 %v2247_v4, %v1632_v52  ;;  %v1170_v22 = vsel %vm1163_vm1, %v1166_v56, %v1169_v40  ;;  %vm1625_vm12 = vcmp.lt.s32.totalorder %v1624_v46, 0  ;;  %v3219_v56 = vld [vmem:[#allocation8_spill] sm:$0xff] }
 0x154   :  { %v1420_v30 = vsel %vm1412_vm8, %v1403_v16, %v1419_v44  ;;  %v1423_v45 = vsel %vm1413_vm11, %v1409_v37, 1326507024  ;;  %v1346_v15 = vsel %vm1625_vm12, 0, %v1624_v46  ;;  %v1417_v62 = vsel %vm1411_vm9, %v1414_v53, %v1416_v2  ;;  %v3221_v46 = vld [vmem:[#allocation6_spill] sm:$0xff] }
 0x155   :  { %v1421_v26 = vsel %vm1411_vm9, %v1418_v60, %v1420_v30  ;;  %v1424_v17 = vsel %vm1412_vm8, %v1406_v3, %v1423_v45  ;;  %v1347_v42 = vsub.s32 32, %v1346_v15  ;;  %v1348_v18 = vshll.u32 %v2987_v25, %v1346_v15 }
 0x156   :  { %v1351_v31 = vsub.s32 4294967266, %v1346_v15  ;;  %v1425_v4 = vsel %vm1411_vm9, %v1422_v8, %v1424_v17  ;;  %v3032_v40 = vmul.u32.u64.low %v2976_v34, %v1421_v26  ;;  %v3033_v28 = vmul.u32.u64.high %v2976_v34, %v1421_v26, %v3032_v40  ;;  %v1758_v26 = vld [vmem:[#allocation2 + $0x5] ss:$0 sm:$0xff] }
 0x157   :  { %v3028_v29 = vmul.u32.u64.low %v2976_v34, %v1425_v4  ;;  %v3029_v52 = vmul.u32.u64.high %v2976_v34, %v1425_v4, %v3028_v29  ;;  %vm1267_vm13 = vcmp.eq.s32.totalorder %v2967_v20, 0  ;;  %v1349_v57 = vshrl.u32 %v2972_v63, %v1347_v42 }
 0x158   :  { %v1352_v21 = vadd.s32 127, %v1351_v31  ;;  %v1171_v25 = vsel %vm1161_vm10, nan, %v1170_v22  ;;  %v1635_v49 = vadd.f32 -0.60653067, %v2951_v33  ;;  %v3043_v55 = vmul.f32 %v2252_v10, %v2980_v9 }
 0x159   :  { %v1525_v7 = vadd.f32 %v2985_v6, %v2958_v19  ;;  %v1350_v1 = vor.u32 %v1349_v57, %v1348_v18  ;;  %v1433_v50 = vmul.u32 %v2976_v34, %v1417_v62  ;;  %v1636_v51 = vadd.f32 -0.60653067, %v2965_v43 }
 0x15a   :  { %v1353_v59 = vshll.u32 %v1352_v21, 23  ;;  %vm1435_vm14 = vc.u32 %v3029_v52, %v3032_v40  ;;  %v1436_v36 = vadd.s32 1, %v3033_v28  ;;  %v3054_v33 = vmul.f32 %v2332_v14, %v2982_v61 }
 0x15b   :  { %v1526_v10 = vadd.f32 %v1525_v7, %v3017_v11  ;;  %v1743_v63 = vpop.eup %1742  ;;  %vm1270_vm15 = vcmp.eq.s32.totalorder %v2967_v20, 2  ;;  %v1357_v58 = vcvt.s32.f32 %v1350_v1  ;;  %v1637_v0 = vadd.f32 -0.60653067, %v1171_v25 }
 0x15c   :  { %v1354_v9 = vor.u32 4788187, %v1353_v59  ;;  %v1745_v34 = vpop.eup %1744  ;;  %v1271_v24 = vxor.u32 2147483648, %v1743_v63  ;;  %v1437_v43 = vsel %vm1435_vm14, %v1436_v36, %v3033_v28  ;;  %v3060_v16 = vmul.f32 %v3219_v56, %v1635_v49 }
 0x15d   :  { %v1527_v41 = vadd.f32 %v1526_v10, %v3043_v55  ;;  %vm1266_vm0 = vcmp.lt.s32.totalorder %v2967_v20, 2  ;;  %v1268_v14 = vxor.u32 2147483648, %v1745_v34  ;;  %v1438_v12 = vadd.s32 %v1437_v43, %v1433_v50 }
 0x15e   :  { %v1355_v61 = vand.u32 2147483647, %v1354_v9  ;;  %vm1264_vm2 = vweird.f32 %v2280_v39  ;;  %v1272_v38 = vsel %vm1270_vm15, %v1271_v24, %v1745_v34  ;;  %v3066_v3 = vmul.f32 %v3220_v27, %v1636_v51 }
 0x15f   :  { %v1528_v53 = vadd.f32 %v1527_v41, %v3054_v33  ;;  %v302_v37 = vsub.f32 0.0, %v3221_v46  ;;  %v1269_v35 = vsel %vm1267_vm13, %v1743_v63, %v1268_v14  ;;  %v1439_v2 = vadd.s32 536870912, %v1438_v12  ;;  %v3224_v46 = vld [vmem:[#allocation7_spill] sm:$0xff] }
 0x160   :  { %v1358_v60 = vmul.f32 %v1357_v58, %v1355_v61  ;;  %v1273_v44 = vsel %vm1266_vm0, %v1269_v35, %v1272_v38  ;;  %vm1277_vm3 = vcmp.lt.s32.totalorder %v2314_v47, 0  ;;  %v3074_v8 = vmul.f32 %v2543_v23, %v1637_v0 }
 0x161   :  { %v1529_v39 = vadd.f32 %v1528_v53, %v3060_v16  ;;  %v1274_v22 = vsel %vm1264_vm2, nan, %v1273_v44  ;;  %vm3079_vm4 = vcmp.le.f32.partialorder %v1275_v48, 0.7853982  ;;  %v3083_v20 = vshrl.u32 %v1439_v2, 30 }
 0x162   :  { %v1359_v45 = vxor.u32 2147483648, %v1358_v60  ;;  %v1638_v15 = vadd.f32 -0.60653067, %v1274_v22  ;;  %v313_v17 = vmul.f32 %v1758_v26, %v302_v37  ;;  %v1361_v18 = vsub.s32 4, %v2969_v5 }
 0x163   :  { %v1530_v62 = vadd.f32 %v1529_v39, %v3066_v3  ;;  %v1441_v42 = vshll.u32 %v3083_v20, 30  ;;  %v1434_v50 = vadd.s32 %v3032_v40, %v3029_v52  ;;  %vm1367_vm9 = vweird.f32 %v2314_v47 }
 0x164   :  { %v1360_v23 = vsel %vm1277_vm3, %v1359_v45, %v1358_v60  ;;  %v3094_v31 = vmul.f32 %v2548_v32, %v1638_v15  ;;  %v333_v57 = vmul.f32 1.442695, %v313_v17  ;;  %v1362_v25 = vsel %vm1277_vm3, %v1361_v18, %v2969_v5 }
 0x165   :  { %v1363_v48 = vsel %vm3079_vm4, %v2314_v47, %v1360_v23  ;;  %v1531_v4 = vadd.f32 %v1530_v62, %v3074_v8  ;;  %v1442_v29 = vsub.s32 %v1438_v12, %v1441_v42  ;;  %v1364_v7 = vsel %vm3079_vm4, 0, %v1362_v25 }
 0x166   :  { %1746 = vcosq.f32 %v1363_v48  ;;  %v1368_v59 = vand.u32 3, %v1364_v7  ;;  %v303_v37 = vsub.f32 0.0, %v3224_v46  ;;  %vm1380_vm10 = vcmp.lt.s32.totalorder %v2318_v13, 0 }
 0x167   :  { %1748 = vsinq.f32 %v1363_v48  ;;  %v1532_v28 = vadd.f32 %v1531_v4, %v3094_v31  ;;  %v1444_v21 = vsub.s32 0, %v1442_v29  ;;  %vm1379_vm8 = vcmp.le.f32.partialorder %v1378_v54, 0.7853982 }
 0x168   :  { %1750 = vpow2.f32 %v333_v57  ;;  %vm1373_vm5 = vcmp.eq.s32.totalorder %v1368_v59, 2  ;;  %vm1370_vm1 = vcmp.eq.s32.totalorder %v1368_v59, 0  ;;  %vm1369_vm7 = vcmp.lt.s32.totalorder %v1368_v59, 2 }
 0x169   :  { %v1627_v49 = vmin.u32 %v1444_v21, %v1442_v29  ;;  %v314_v44 = vmul.f32 %v1758_v26, %v303_v37  ;;  %v1464_v22 = vsub.s32 4, %v3083_v20  ;;  %vm1470_vm14 = vweird.f32 %v2318_v13  ;;  %v3225_v21 = vld [vmem:[#allocation5_spill] sm:$0xff] }
 0x16a   :  { %vm1513_vm15 = vcmp.lt.s32.totalorder %v3225_v21, 81 }
 0x16b   :  { %v1446_v32 = vclz %v1627_v49  ;;  %v335_v45 = vmul.f32 1.442695, %v314_v44  ;;  %v1465_v15 = vsel %vm1380_vm10, %v1464_v22, %v3083_v20 }
 0x16c   :  { %v1467_v62 = vsel %vm1379_vm8, 0, %v1465_v15 }
 0x16d   :  { %v1628_v1 = vadd.s32 4294967294, %v1446_v32  ;;  %v1471_v17 = vand.u32 3, %v1467_v62 }
 0x16f   :  { %vm1629_vm6 = vcmp.lt.s32.totalorder %v1628_v1, 0  ;;  %vm1476_vm11 = vcmp.eq.s32.totalorder %v1471_v17, 2  ;;  %vm1473_vm12 = vcmp.eq.s32.totalorder %v1471_v17, 0  ;;  %vm1472_vm13 = vcmp.lt.s32.totalorder %v1471_v17, 2 }
 0x170   :  { %v1449_v51 = vsel %vm1629_vm6, 0, %v1628_v1 }
 0x171   :  { %v1450_v36 = vsub.s32 32, %v1449_v51  ;;  %v1451_v10 = vshll.u32 %v1442_v29, %v1449_v51  ;;  %v1454_v63 = vsub.s32 4294967266, %v1449_v51 }
 0x173   :  { %v1747_v9 = vpop.eup %1746  ;;  %v1452_v0 = vshrl.u32 %v1434_v50, %v1450_v36  ;;  %v1455_v34 = vadd.s32 127, %v1454_v63 }
 0x174   :  { %v1749_v58 = vpop.eup %1748  ;;  %v1374_v5 = vxor.u32 2147483648, %v1747_v9 }
 0x175   :  { %v1371_v24 = vxor.u32 2147483648, %v1749_v58  ;;  %v1453_v56 = vor.u32 %v1452_v0, %v1451_v10  ;;  %v1456_v41 = vshll.u32 %v1455_v34, 23  ;;  %v1751_v12 = vpop.eup %1750 }
 0x176   :  { %v1375_v43 = vsel %vm1373_vm5, %v1374_v5, %v1749_v58 }
 0x177   :  { %v1372_v52 = vsel %vm1370_vm1, %v1747_v9, %v1371_v24  ;;  %v1457_v14 = vor.u32 4788187, %v1456_v41  ;;  %v1460_v61 = vcvt.s32.f32 %v1453_v56 }
 0x178   :  { %v1376_v40 = vsel %vm1369_vm7, %v1372_v52, %v1375_v43 }
 0x179   :  { %v1377_v38 = vsel %vm1367_vm9, nan, %v1376_v40  ;;  %v1458_v27 = vand.u32 2147483647, %v1457_v14 }
 0x17a   :  { %v1639_v53 = vadd.f32 -0.60653067, %v1377_v38 }
 0x17b   :  { %v1461_v35 = vmul.f32 %v1460_v61, %v1458_v27 }
 0x17c   :  { %v1501_v60 = vmul.f32 %v1751_v12, %v1639_v53 }
 0x17d   :  { %v1462_v47 = vxor.u32 2147483648, %v1461_v35 }
 0x17e   :  { %v1533_v2 = vadd.f32 %v1532_v28, %v1501_v60 }
 0x17f   :  { %v1463_v39 = vsel %vm1380_vm10, %v1462_v47, %v1461_v35 }
 0x180   :  { %v1466_v30 = vsel %vm1379_vm8, %v2318_v13, %v1463_v39 }
 0x181   :  { %1752 = vcosq.f32 %v1466_v30 }
 0x182   :  { %1754 = vsinq.f32 %v1466_v30 }
 0x183   :  { %1756 = vpow2.f32 %v335_v45 }
 0x18e   :  { %v1753_v23 = vpop.eup %1752 }
 0x18f   :  { %v1755_v42 = vpop.eup %1754  ;;  %v1477_v54 = vxor.u32 2147483648, %v1753_v23 }
 0x190   :  { %v1474_v26 = vxor.u32 2147483648, %v1755_v42  ;;  %v1757_v29 = vpop.eup %1756 }
 0x191   :  { %v1478_v18 = vsel %vm1476_vm11, %v1477_v54, %v1755_v42 }
 0x192   :  { %v1475_v48 = vsel %vm1473_vm12, %v1753_v23, %v1474_v26 }
 0x193   :  { %v1479_v4 = vsel %vm1472_vm13, %v1475_v48, %v1478_v18 }
 0x194   :  { %v1480_v28 = vsel %vm1470_vm14, nan, %v1479_v4 }
 0x195   :  { %v1640_v57 = vadd.f32 -0.60653067, %v1480_v28 }
 0x197   :  { %v1502_v20 = vmul.f32 %v1757_v29, %v1640_v57 }
 0x199   :  { %v1524_v25 = vsel %vm1513_vm15, %v1502_v20, 0.0 }
 0x19a   :  { %v1534_v49 = vadd.f32 %v1533_v2, %v1524_v25 }
 0x19c   :  { %v1535_v7 = vrot.slane %v1534_v49, 4 }
 0x19e   :  { %v1536_v32 = vadd.f32 %v1535_v7, %v1534_v49 }
 0x1a0   :  { %v1537_v1 = vrot.slane %v1536_v32, 2 }
 0x1a2   :  { %v1538_v59 = vadd.f32 %v1537_v1, %v1536_v32 }
 0x1a4   :  { %v1539_v50 = vrot.slane %v1538_v59, 1 }
 0x1a6   :  { %v1540_v51 = vadd.f32 %v1539_v50, %v1538_v59 }
 0x1a8   :  { %v1541_v36 = vmul.f32 0.012345679, %v1540_v51 }
 0x1aa   :  { %v1542_v13 = vsub.f32 %v2958_v19, %v1541_v36  ;;  %v1543_v10 = vsub.f32 %v2985_v6, %v1541_v36  ;;  %v1544_v63 = vsub.f32 %v3017_v11, %v1541_v36  ;;  %v1545_v9 = vsub.f32 %v3043_v55, %v1541_v36 }
 0x1ab   :  { %v1546_v58 = vsub.f32 %v3054_v33, %v1541_v36  ;;  %v1547_v5 = vsub.f32 %v3060_v16, %v1541_v36  ;;  %v1548_v0 = vsub.f32 %v3066_v3, %v1541_v36  ;;  %v1549_v34 = vsub.f32 %v3074_v8, %v1541_v36 }
 0x1ac   :  { %v1550_v24 = vsub.f32 %v3094_v31, %v1541_v36  ;;  %v1551_v43 = vsub.f32 %v1501_v60, %v1541_v36  ;;  %v1552_v56 = vsub.f32 %v1502_v20, %v1541_v36  ;;  %1553 = vst [vmem:[%s3158_s1] sm:$0xff] %v1542_v13  ;;  %1554 = vst [vmem:[%s3158_s1 + $0x8] sm:$0xff] %v1543_v10 }
 0x1ad   :  { %1555 = vst [vmem:[%s3158_s1 + $0x10] sm:$0xff] %v1544_v63  ;;  %1556 = vst [vmem:[%s3158_s1 + $0x18] sm:$0xff] %v1545_v9 }
 0x1ae   :  { %1557 = vst [vmem:[%s3158_s1 + $0x20] sm:$0xff] %v1546_v58  ;;  %1558 = vst [vmem:[%s3158_s1 + $0x28] sm:$0xff] %v1547_v5 }
 0x1af   :  { %1559 = vst [vmem:[%s3158_s1 + $0x30] sm:$0xff] %v1548_v0  ;;  %1560 = vst [vmem:[%s3158_s1 + $0x38] sm:$0xff] %v1549_v34 }
 0x1b0   :  { %1561 = vst [vmem:[%s3158_s1 + $0x40] sm:$0xff] %v1550_v24  ;;  %1562 = vst [vmem:[%s3158_s1 + $0x48] sm:$0xff] %v1551_v43 }
 0x1b1   :  { %1563 = vst [vmem:[%s3158_s1 + $0x50] sm:$0xff] %v1552_v56 }
 0x1b2   :  { %1568 = vsyncpa [#allocation3], 1 }

</bundles_post_ra>
